<compile_context>
chip_gen: v6e
topology: v6e:2x2x1
jax: 0.10.0
libtpu: 0.0.40
codegen_flags: <defaults>
</compile_context>

<pallas_src>
import functools

import jax
import jax.numpy as jnp
import numpy as np
from jax.experimental import pallas as pl
from jax.experimental.pallas import tpu as pltpu

C_IN, C_OUT, K, R = 64, 256, 3, 2       # in/out channels, conv kernel, shuffle factor
C_SHUF = C_OUT // (R * R)               # 64 channels after pixel-shuffle
KKC = K * K * C_IN                      # 576 contraction width


def upsample_unit_kernel(x_ref, w_ref, ba_ref, o_ref, *, th, tw):
    # x_ref : (TH+2, W+2, 64) bf16  input row band, 1-px zero halo on all sides
    # w_ref : (576, 256)      bf16  conv taps, rows (dy,dx,cin), cols permuted (i,j,c)
    # ba_ref: (2, 256)        f32   row 0 = bias, row 1 = PReLU alpha (same col order)
    # o_ref : (TH, W, 256)    bf16  conv + bias + PReLU (shuffle folded into cols)
    band = x_ref[...]
    # On-chip "im2col": 9 static tap slices -> (TH, W, 576) -> (TH*W, 576).
    taps = [band[dy:dy + th, dx:dx + tw, :] for dy in range(K) for dx in range(K)]
    patches = jnp.concatenate(taps, axis=-1).reshape(th * tw, KKC)
    # Single full-width MXU contraction, f32 accumulation.
    y = jnp.dot(patches, w_ref[...], preferred_element_type=jnp.float32)
    ba = ba_ref[...]
    y = y + ba[0:1, :]
    y = jnp.where(y > 0, y, ba[1:2, :] * y)
    o_ref[...] = y.reshape(th, tw, C_OUT).astype(o_ref.dtype)


@functools.partial(jax.jit, static_argnames=("tile_rows",))
def upsample_unit(x_nchw, w_oihw, bias, alpha, *, tile_rows=None):
    """x_nchw: (N, 64, H, W) f32 -> (N, 64, 2H, 2W) f32 (same semantics as PyTorch,
    matmul runs in bf16 with f32 accumulation)."""
    N, C, H, W = x_nchw.shape
    assert C == C_IN
    # Row-band height: TILE_M = TH*W matmul rows, target ~1024 (review: 512-1024).
    if tile_rows is None:
        tile_rows = max(1, min(H, 1024 // max(W, 1)))
    th = min(int(tile_rows), H)
    nb = pl.cdiv(H, th)                 # number of bands (last may be padded)
    hp = nb * th                        # H rounded up to a whole number of bands
    wp = W + 2

    # ---- layout glue (fused XLA, ~1 pass over the input) --------------------
    # NCHW -> NHWC bf16, zero-pad ('same' + bottom band padding), then duplicate
    # the 2 halo rows per band so every Pallas block is a plain Blocked window.
    x = jnp.transpose(x_nchw, (0, 2, 3, 1)).astype(jnp.bfloat16)       # (N,H,W,64)
    x_pad = jnp.pad(x, ((0, 0), (1, hp - H + 1), (1, 1), (0, 0)))      # (N,hp+2,W+2,64)
    x_bands = jnp.stack([x_pad[:, b * th:b * th + th + 2] for b in range(nb)],
                        axis=1)                                        # (N,nb,TH+2,W+2,64)
    x_bands = x_bands.reshape(N * nb, th + 2, wp, C_IN)

    # Fold the PixelShuffle channel permutation into the columns:
    # kernel column m = (2i+j)*64 + c  <->  conv output channel k = 4c + 2i + j.
    perm = (jnp.arange(C_OUT) % C_SHUF) * (R * R) + jnp.arange(C_OUT) // C_SHUF
    w = jnp.transpose(w_oihw, (2, 3, 1, 0))[..., perm]                 # (3,3,64,256)
    w = w.reshape(KKC, C_OUT).astype(jnp.bfloat16)
    # PReLU slope for column m is alpha[m % 64]; bias follows the permutation.
    ba = jnp.stack([bias[perm], jnp.tile(alpha, R * R)], axis=0).astype(jnp.float32)

    # ---- Pallas kernel: single flattened parallel grid axis ------------------
    grid = (N * nb,)
    kernel = functools.partial(upsample_unit_kernel, th=th, tw=W)
    conv_act = pl.pallas_call(
        kernel,
        out_shape=jax.ShapeDtypeStruct((N * nb, th, W, C_OUT), jnp.bfloat16),
        grid_spec=pltpu.PrefetchScalarGridSpec(
            num_scalar_prefetch=0,
            grid=grid,
            in_specs=[
                pl.BlockSpec((None, th + 2, wp, C_IN), lambda t: (t, 0, 0, 0)),
                pl.BlockSpec((KKC, C_OUT), lambda t: (0, 0)),   # VMEM-resident
                pl.BlockSpec((2, C_OUT), lambda t: (0, 0)),     # VMEM-resident
            ],
            out_specs=pl.BlockSpec((None, th, W, C_OUT), lambda t: (t, 0, 0, 0)),
        ),
        compiler_params=pltpu.CompilerParams(
            dimension_semantics=("parallel",),
            vmem_limit_bytes=32 * 1024 * 1024),
    )(x_bands, w, ba)

    # ---- pixel shuffle: columns already (i, j, c) => one fused transpose -----
    y = conv_act.reshape(N, hp, W, C_OUT)[:, :H]          # drop band padding rows
    y = y.reshape(N, H, W, R, R, C_SHUF)                  # (n, h, w, i, j, c)
    y = jnp.transpose(y, (0, 5, 1, 3, 2, 4))              # (n, c, h, i, w, j)
    return y.reshape(N, C_SHUF, H * R, W * R).astype(jnp.float32)


def reference(x_nchw, w_oihw, bias, alpha):
    """Pure-JAX reference matching the PyTorch forward (for verification)."""
    N, _, H, W = x_nchw.shape
    conv = jax.lax.conv_general_dilated(
        x_nchw, w_oihw, window_strides=(1, 1), padding="SAME",
        dimension_numbers=("NCHW", "OIHW", "NCHW"),
    ) + bias[None, :, None, None]
    ps = conv.reshape(N, C_SHUF, R, R, H, W)
    ps = jnp.transpose(ps, (0, 1, 4, 2, 5, 3)).reshape(N, C_SHUF, H * R, W * R)
    return jnp.where(ps > 0, ps, alpha[None, :, None, None] * ps)


if __name__ == "__main__":
    key = jax.random.PRNGKey(0)
    k_x, k_w, k_b, k_a = jax.random.split(key, 4)

    # Conv2d(64,256,3): weight (256,64,3,3), bias (256,); PReLU(64): (64,)
    w_conv = jax.random.normal(k_w, (C_OUT, C_IN, K, K), dtype=jnp.float32) * 0.05
    b_conv = jax.random.normal(k_b, (C_OUT,), dtype=jnp.float32) * 0.1
    alpha = jax.random.uniform(k_a, (C_SHUF,), dtype=jnp.float32,
                               minval=0.1, maxval=0.4)

    def check(x, **kw):
        out = jax.block_until_ready(upsample_unit(x, w_conv, b_conv, alpha, **kw))
        n, _, h, w = x.shape
        assert out.shape == (n, C_SHUF, h * R, w * R), out.shape
        # Kernel matmul is bf16 x bf16 -> f32 and the kernel stores bf16, so
        # compare against the f32 reference on bf16-rounded x / w with a
        # bf16-level tolerance.
        xq = x.astype(jnp.bfloat16).astype(jnp.float32)
        wq = w_conv.astype(jnp.bfloat16).astype(jnp.float32)
        ref = jax.block_until_ready(reference(xq, wq, b_conv, alpha))
        np.testing.assert_allclose(np.asarray(out), np.asarray(ref),
                                   rtol=1e-2, atol=1e-2)

    # Case 1: batch=2, 64ch, 16x16 -> one 256-pixel band per image, grid (2,).
    x1 = jax.random.normal(k_x, (2, C_IN, 16, 16), dtype=jnp.float32)
    check(x1)

    # Case 2 (review request): H not divisible by the band height -> last band
    # is zero-padded and its extra rows are sliced off after the kernel.
    x2 = jax.random.normal(k_x, (1, C_IN, 12, 16), dtype=jnp.float32)
    check(x2, tile_rows=8)

    print("KERNEL_OK")
</pallas_src>

<mosaic_0001>
module attributes {stable_mosaic.version = 11 : i64} {
  func.func @upsample_unit_kernel(%arg0: i32, %arg1: memref<1x18x18x64xbf16, #tpu.memory_space<vmem>>, %arg2: memref<576x256xbf16, #tpu.memory_space<vmem>>, %arg3: memref<2x256xf32, #tpu.memory_space<vmem>>, %arg4: memref<1x16x16x256xbf16, #tpu.memory_space<vmem>>) attributes {dimension_semantics = [#tpu.dimension_semantics<parallel>], iteration_bounds = array<i64: 2>, scalar_prefetch = 0 : i64, scratch_operands = 0 : i64, tpu.core_type = #tpu.core_type<tc>, window_params = [{transform_indices = @transform_0, window_bounds = array<i64: 1, 18, 18, 64>}, {pipeline_mode = #tpu.pipeline_mode<synchronous>, transform_indices = @transform_1, window_bounds = array<i64: 576, 256>}, {pipeline_mode = #tpu.pipeline_mode<synchronous>, transform_indices = @transform_2, window_bounds = array<i64: 2, 256>}, {transform_indices = @transform_3, window_bounds = array<i64: 1, 16, 16, 256>}]} {
    %c0 = arith.constant 0 : index
    %c0_0 = arith.constant 0 : index
    %c0_1 = arith.constant 0 : index
    %c0_2 = arith.constant 0 : index
    %0 = vector.load %arg1[%c0, %c0_0, %c0_1, %c0_2] : memref<1x18x18x64xbf16, #tpu.memory_space<vmem>>, vector<1x18x18x64xbf16>
    %1 = vector.shape_cast %0 : vector<1x18x18x64xbf16> to vector<18x18x64xbf16>
    %2 = vector.extract_strided_slice %1 {offsets = [0, 0, 0], sizes = [16, 16, 64], strides = [1, 1, 1]} : vector<18x18x64xbf16> to vector<16x16x64xbf16>
    %3 = vector.extract_strided_slice %1 {offsets = [0, 1, 0], sizes = [16, 16, 64], strides = [1, 1, 1]} : vector<18x18x64xbf16> to vector<16x16x64xbf16>
    %4 = vector.extract_strided_slice %1 {offsets = [0, 2, 0], sizes = [16, 16, 64], strides = [1, 1, 1]} : vector<18x18x64xbf16> to vector<16x16x64xbf16>
    %5 = vector.extract_strided_slice %1 {offsets = [1, 0, 0], sizes = [16, 16, 64], strides = [1, 1, 1]} : vector<18x18x64xbf16> to vector<16x16x64xbf16>
    %6 = vector.extract_strided_slice %1 {offsets = [1, 1, 0], sizes = [16, 16, 64], strides = [1, 1, 1]} : vector<18x18x64xbf16> to vector<16x16x64xbf16>
    %7 = vector.extract_strided_slice %1 {offsets = [1, 2, 0], sizes = [16, 16, 64], strides = [1, 1, 1]} : vector<18x18x64xbf16> to vector<16x16x64xbf16>
    %8 = vector.extract_strided_slice %1 {offsets = [2, 0, 0], sizes = [16, 16, 64], strides = [1, 1, 1]} : vector<18x18x64xbf16> to vector<16x16x64xbf16>
    %9 = vector.extract_strided_slice %1 {offsets = [2, 1, 0], sizes = [16, 16, 64], strides = [1, 1, 1]} : vector<18x18x64xbf16> to vector<16x16x64xbf16>
    %10 = vector.extract_strided_slice %1 {offsets = [2, 2, 0], sizes = [16, 16, 64], strides = [1, 1, 1]} : vector<18x18x64xbf16> to vector<16x16x64xbf16>
    %11 = tpu.concatenate %2, %3, %4, %5, %6, %7, %8, %9, %10 in 2 : vector<16x16x64xbf16>, vector<16x16x64xbf16>, vector<16x16x64xbf16>, vector<16x16x64xbf16>, vector<16x16x64xbf16>, vector<16x16x64xbf16>, vector<16x16x64xbf16>, vector<16x16x64xbf16>, vector<16x16x64xbf16> -> vector<16x16x576xbf16>
    %12 = vector.shape_cast %11 : vector<16x16x576xbf16> to vector<256x576xbf16>
    %c0_3 = arith.constant 0 : index
    %c0_4 = arith.constant 0 : index
    %13 = vector.load %arg2[%c0_3, %c0_4] : memref<576x256xbf16, #tpu.memory_space<vmem>>, vector<576x256xbf16>
    %cst = arith.constant dense<0.000000e+00> : vector<256x256xf32>
    %14 = tpu.matmul %12, %13, %cst {dimension_numbers = #tpu.dot_dimension_numbers<[1], [0], [0], [1], [0, 0, 1, 1], [], []>} : vector<256x576xbf16>, vector<576x256xbf16>, vector<256x256xf32> -> vector<256x256xf32>
    %c0_5 = arith.constant 0 : index
    %c0_6 = arith.constant 0 : index
    %15 = vector.load %arg3[%c0_5, %c0_6] : memref<2x256xf32, #tpu.memory_space<vmem>>, vector<2x256xf32>
    %16 = vector.extract_strided_slice %15 {offsets = [0, 0], sizes = [1, 256], strides = [1, 1]} : vector<2x256xf32> to vector<1x256xf32>
    %17 = vector.broadcast %16 : vector<1x256xf32> to vector<256x256xf32>
    %18 = arith.addf %14, %17 : vector<256x256xf32>
    %cst_7 = arith.constant 0.000000e+00 : f32
    %19 = vector.broadcast %cst_7 : f32 to vector<256x256xf32>
    %20 = arith.cmpf ogt, %18, %19 : vector<256x256xf32>
    %21 = vector.extract_strided_slice %15 {offsets = [1, 0], sizes = [1, 256], strides = [1, 1]} : vector<2x256xf32> to vector<1x256xf32>
    %22 = vector.broadcast %21 : vector<1x256xf32> to vector<256x256xf32>
    %23 = arith.mulf %22, %18 : vector<256x256xf32>
    %24 = arith.select %20, %18, %23 : vector<256x256xi1>, vector<256x256xf32>
    %25 = vector.shape_cast %24 : vector<256x256xf32> to vector<16x16x256xf32>
    %26 = arith.truncf %25 : vector<16x16x256xf32> to vector<16x16x256xbf16>
    %c0_8 = arith.constant 0 : index
    %c0_9 = arith.constant 0 : index
    %c0_10 = arith.constant 0 : index
    %c0_11 = arith.constant 0 : index
    %27 = vector.load %arg4[%c0_8, %c0_9, %c0_10, %c0_11] : memref<1x16x16x256xbf16, #tpu.memory_space<vmem>>, vector<1x16x16x256xbf16>
    %28 = vector.shape_cast %27 : vector<1x16x16x256xbf16> to vector<16x16x256xbf16>
    %29 = vector.shape_cast %26 : vector<16x16x256xbf16> to vector<1x16x16x256xbf16>
    tpu.vector_store %arg4[%c0_8, %c0_9, %c0_10, %c0_11], %29 {strides = array<i32>} : memref<1x16x16x256xbf16, #tpu.memory_space<vmem>>, vector<1x16x16x256xbf16>,
    return
  }
  func.func @transform_0(%arg0: i32) -> (i32, i32, i32, i32) {
    %c0_i32 = arith.constant 0 : i32
    %c0_i32_0 = arith.constant 0 : i32
    %c0_i32_1 = arith.constant 0 : i32
    %c0_i32_2 = arith.constant 0 : i32
    return %arg0, %c0_i32, %c0_i32_0, %c0_i32_1 : i32, i32, i32, i32
  }
  func.func @transform_1(%arg0: i32) -> (i32, i32) {
    %c0_i32 = arith.constant 0 : i32
    %c0_i32_0 = arith.constant 0 : i32
    %c0_i32_1 = arith.constant 0 : i32
    return %c0_i32, %c0_i32_0 : i32, i32
  }
  func.func @transform_2(%arg0: i32) -> (i32, i32) {
    %c0_i32 = arith.constant 0 : i32
    %c0_i32_0 = arith.constant 0 : i32
    %c0_i32_1 = arith.constant 0 : i32
    return %c0_i32, %c0_i32_0 : i32, i32
  }
  func.func @transform_3(%arg0: i32) -> (i32, i32, i32, i32) {
    %c0_i32 = arith.constant 0 : i32
    %c0_i32_0 = arith.constant 0 : i32
    %c0_i32_1 = arith.constant 0 : i32
    %c0_i32_2 = arith.constant 0 : i32
    return %arg0, %c0_i32, %c0_i32_0, %c0_i32_1 : i32, i32, i32, i32
  }
}

</mosaic_0001>

<bundles_post_ra>
// kernel: tile.8
= control target key start
LH: loop header
LB: loop body
LE: loop exit
PB: predicated region body
PF: predicated region fallthrough
CT: control target
= control target key end

     0   :  { %s22_s0 = inlined_call_operand.vmem [shape: f32[64], index: 0, kind: input, shape index: {}]   ;;  %s23_s1 = inlined_call_operand.vmem [shape: f32[4,64], index: 1, kind: output, shape index: {}]  }
   0x1   :  { %v4_v0 = vld [vmem:[%s22_s0] ss:$0 sm:$0xff] }
   0x2   :  { %5 = vst [vmem:[%s23_s1] sm:$0xf] %v4_v0 }

// kernel: tile.9
= control target key start
LH: loop header
LB: loop body
LE: loop exit
PB: predicated region body
PF: predicated region fallthrough
CT: control target
= control target key end

     0   :  { %s7_s8 = smov 3  ;;  %vm9_vm0 = vcmask 523264   ;;  %s34_s9 = smov 64   ;;  %vm16_vm1 = vcmask 1048064   ;;  %s54_s0 = inlined_call_operand.vmem [shape: f32[4,64], index: 0, kind: input, shape index: {}]   ;;  %s55_s1 = inlined_call_operand.vmem [shape: f32[1,256], index: 1, kind: output, shape index: {}]  }
   0x1   :  { %v5_v0 = vld [vmem:[%s54_s0] sm:$0xf]  ;;  %s12_s0 = smov 3 }
   0x2   :  { %6 = vst [vmem:[#allocation1] sm:$0xf] %v5_v0 }
   0x9   :  { %v13_v1 = vld [vmem:[#allocation1 + $0x1] ss:$2 sm:%s12_s0]   ;;  %v8_v2 = vld [vmem:[#allocation1] ss:$2 sm:%s7_s8]  }
   0xa   :  { %14 = vrot.lane.b32.xlu0 %v13_v1, %s34_s9  ;;  %10 = vst.msk [vmem:[#allocation0] ss:$8 sm:$0x3] %vm9_vm0, %v8_v2  }
  0x7c   :  { %v15_v3 = vpop.permute.xlu0 %14  }
  0x7d   :  { %17 = vst.msk [vmem:[#allocation0] ss:$8 sm:$0x3] %vm16_vm1, %v15_v3  }
  0x84   :  { %v22_v4 = vld [vmem:[#allocation0] sm:$0x1]  ;;  %v27_v5 = vld [vmem:[#allocation0 + $0x8] sm:$0x1] }
  0x85   :  { %25 = vst [vmem:[%s55_s1] sm:$0x1] %v22_v4  ;;  %32 = vst [vmem:[%s55_s1 + $0x1] sm:$0x1] %v27_v5 }

// kernel: upsample_unit.1
= control target key start
LH: loop header
LB: loop body
LE: loop exit
PB: predicated region body
PF: predicated region fallthrough
CT: control target
= control target key end

     0   :  { %s2895_s12 = smov 0   ;;  %s4097_s0 = inlined_call_operand.vmem [shape: bf16[2,18,18,64], index: 0, kind: input, shape index: {}]   ;;  %s4098_s1 = inlined_call_operand.vmem [shape: bf16[576,256], index: 1, kind: input, shape index: {}]   ;;  %s4099_s2 = inlined_call_operand.vmem [shape: f32[2,256], index: 2, kind: input, shape index: {}]   ;;  %s4100_s3 = inlined_call_operand.vmem [shape: bf16[2,16,16,256], index: 3, kind: output, shape index: {}]  }
   0x1 LB: > { %s2479_s13 = sadd.s32 4294967295, %s2871_s12   ;;  %p2483_p0 = scmp.ge.s32.totalorder %s2871_s12, 1  ;;  %s2871_s12 = sphi %s2895_s12, %s13_s12  }
   0x2   : > { %p137_p1 = scmp.lt.s32.totalorder %s2871_s12, 3 }
   0x4   : > { %p138_p2 = pnand %p2483_p0, %p137_p1 }
   0x6   : > { %141 = sbr.rel (%p138_p2) target bundleno = 536 (0x218), region = 32 }
   0xb   : > { %p161_p3 = scmp.lt.s32.totalorder %s2479_s13, 1  ;;  %v2751_v0 = vld [vmem:[%s4098_s1 + $0x74] ss:$8 sps:$4 sm:$0xff]   ;;  %v2753_v1 = vld [vmem:[%s4098_s1 + $0x70] ss:$8 sps:$4 sm:$0xff]   ;;  %s2873_s5 = smov 64  }
   0xc   : > { %v2756_v2 = vld [vmem:[%s4098_s1 + $0x64] ss:$8 sps:$4 sm:$0xff]   ;;  %2678 = vmatprep.subr.bf16.mxu1 %v2751_v0  ;;  %1411 = vmatprep.subr.bf16.mxu0 %v2751_v0  ;;  %v2758_v3 = vld [vmem:[%s4098_s1 + $0x60] ss:$8 sps:$4 sm:$0xff]   ;;  %v2760_v4 = vld [vmem:[%s4098_s1 + $0x54] ss:$8 sps:$4 sm:$0xff]  }
   0xd   : > { %s4148_s13 = smov (!%p161_p3, %s2479_s13), 1  ;;  %2694 = vmatpush1.bf16.msra.mxu1 %v2753_v1  ;;  %1412 = vmatpush1.bf16.msra.mxu0 %v2753_v1  ;;  %v2762_v5 = vld [vmem:[%s4098_s1 + $0x50] ss:$8 sps:$4 sm:$0xff]   ;;  %vm354_vm0 = vsmask.f32 7424  ;;  %vm579_vm1 = vcmask 1046528  }
   0xe   : > { %s2710_s20 = smul.u32 216, %s4148_s13  ;;  %2679 = vmatprep.subr.bf16.mxu1 %v2756_v2  ;;  %1413 = vmatprep.subr.bf16.mxu0 %v2756_v2  ;;  %v2763_v7 = vld [vmem:[%s4098_s1 + $0x44] ss:$8 sps:$4 sm:$0xff]   ;;  %v2765_v11 = vld [vmem:[%s4098_s1 + $0x40] ss:$8 sps:$4 sm:$0xff]   ;;  %vm742_vm2 = vcmask 523264  }
   0xf   : > { %v2766_v13 = vld [vmem:[%s4098_s1 + $0x34] ss:$8 sps:$4 sm:$0xff]   ;;  %v2768_v23 = vld [vmem:[%s4098_s1 + $0x30] ss:$8 sps:$4 sm:$0xff]   ;;  %s2645_s17 = sshll.u32 %s4148_s13, 8 }
  0x10   : > { %s2924_s27 = scalar_lea.vmem %s4097_s0, %s2710_s20  ;;  %s3914_s20 = scalar_lea.vmem %s4100_s3, %s2645_s17 }
  0x11   : > { %v2930_v6 = vld [vmem:[%s2924_s27 + $0x6c] sm:$0xff]   ;;  %2695 = vmatpush1.bf16.msra.mxu1 %v2758_v3  ;;  %1414 = vmatpush1.bf16.msra.mxu0 %v2758_v3  ;;  %v2943_v9 = vld [vmem:[%s2924_s27 + $0x60] sm:$0xff]   ;;  %v2946_v10 = vld [vmem:[%s2924_s27 + $0x68] ss:$0 sps:$4 sm:$0x11]  }
  0x12   : > { %v2936_v8 = vld [vmem:[%s2924_s27 + $0xc] sm:$0xff]   ;;  %649 = vrot.lane.b32.xlu0 %v2930_v6, %s2873_s5  ;;  %2680 = vmatprep.subr.bf16.mxu1 %v2760_v4  ;;  %v2952_v12 = vld [vmem:[%s2924_s27] sm:$0xff]   ;;  %v452_v14 = vshrl.u32 %v2943_v9, 16  ;;  %v454_v15 = vshll.u32 %v2943_v9, 16  ;;  %v459_v16 = vshll.u32 %v2946_v10, 16  ;;  %v464_v26 = vshrl.u32 %v2930_v6, 16 }
  0x13   : > { %633 = vrot.lane.b32.xlu1 %v2936_v8, %s2873_s5  ;;  %1415 = vmatprep.subr.bf16.mxu0 %v2760_v4  ;;  %v2961_v17 = vld [vmem:[%s2924_s27 + $0x8] ss:$0 sps:$4 sm:$0x11]   ;;  %v356_v18 = vshrl.u32 %v2952_v12, 16  ;;  %v358_v19 = vshll.u32 %v2952_v12, 16  ;;  %v466_v27 = vshll.u32 %v2930_v6, 16 }
  0x14   : > { %v456_v20 = vrot.slane %v454_v15, 1  ;;  %v461_v21 = vrot.slane %v459_v16, 1  ;;  %v363_v22 = vshll.u32 %v2961_v17, 16  ;;  %v2970_v25 = vld [vmem:[%s2924_s27 + $0x74] ss:$0 sps:$4 sm:$0x11]  }
  0x15   : > { %2696 = vmatpush1.bf16.msra.mxu1 %v2762_v5  ;;  %1416 = vmatpush1.bf16.msra.mxu0 %v2762_v5  ;;  %v360_v24 = vrot.slane %v358_v19, 1  ;;  %v368_v30 = vshrl.u32 %v2936_v8, 16  ;;  %v468_v32 = vrot.slane %v466_v27, 1  ;;  %v471_v33 = vshll.u32 %v2970_v25, 16  ;;  %v2981_v36 = vld [vmem:[%s2924_s27 + $0x78] sm:$0xff]   ;;  %v3009_v53 = vld [vmem:[%s2924_s27 + $0x84] sm:$0xff]  }
  0x16   : > { %2681 = vmatprep.subr.bf16.mxu1 %v2763_v7  ;;  %1417 = vmatprep.subr.bf16.mxu0 %v2763_v7  ;;  %v457_v28 = vor.u32 %v456_v20, %v452_v14  ;;  %v365_v29 = vrot.slane %v363_v22, 1  ;;  %v370_v34 = vshll.u32 %v2936_v8, 16  ;;  %v2984_v37 = vld [vmem:[%s2924_s27 + $0x14] ss:$0 sps:$4 sm:$0x11]   ;;  %v2990_v41 = vld [vmem:[%s2924_s27 + $0x18] sm:$0xff]  }
  0x17   : > { %v361_v31 = vor.u32 %v360_v24, %v356_v18  ;;  %v469_v39 = vor.u32 %v468_v32, %v464_v26  ;;  %v473_v40 = vrot.slane %v471_v33, 1  ;;  %v375_v43 = vshll.u32 %v2984_v37, 16  ;;  %v2995_v44 = vld [vmem:[%s2924_s27 + $0x80] ss:$0 sps:$4 sm:$0x11]   ;;  %v3026_v63 = vld [vmem:[%s2924_s27 + $0x24] sm:$0xff]  }
  0x18   : > { %v2978_v35 = vsel %vm354_vm0, %v457_v28, %v461_v21  ;;  %v372_v42 = vrot.slane %v370_v34, 1  ;;  %v476_v45 = vshrl.u32 %v2981_v36, 16  ;;  %v478_v46 = vshll.u32 %v2981_v36, 16  ;;  %v3004_v52 = vld [vmem:[%s2924_s27 + $0x20] ss:$0 sps:$4 sm:$0x11]  }
  0x19   : > { %2697 = vmatpush1.bf16.msra.mxu1 %v2765_v11  ;;  %1418 = vmatpush1.bf16.msra.mxu0 %v2765_v11  ;;  %v366_v38 = vsel %vm354_vm0, %v361_v31, %v365_v29  ;;  %v3000_v47 = vsel %vm354_vm0, %v469_v39, %v473_v40  ;;  %v377_v49 = vrot.slane %v375_v43, 1  ;;  %v483_v51 = vshll.u32 %v2995_v44, 16  ;;  %v3020_v61 = vld [vmem:[%s2924_s27 + $0x8c] ss:$0 sps:$4 sm:$0x11]   ;;  %v3072_v33 = vld [vmem:[%s2924_s27 + $0x9c] sm:$0xff]  }
  0x1a   : > { %2682 = vmatprep.subr.bf16.mxu1 %v2766_v13  ;;  %1419 = vmatprep.subr.bf16.mxu0 %v2766_v13  ;;  %v373_v48 = vor.u32 %v372_v42, %v368_v30  ;;  %v480_v50 = vrot.slane %v478_v46, 1  ;;  %v382_v54 = vshll.u32 %v2990_v41, 16  ;;  %v380_v56 = vshrl.u32 %v2990_v41, 16  ;;  %v3033_v3 = vld [vmem:[%s2924_s27 + $0x2c] ss:$0 sps:$4 sm:$0x11]  }
  0x1b   : > { %563 = vrot.lane.b32.xlu0 %v2978_v35, %s2873_s5  ;;  %547 = vrot.lane.b32.xlu1 %v366_v38, %s2873_s5  ;;  %v387_v57 = vshll.u32 %v3004_v52, 16  ;;  %v485_v59 = vrot.slane %v483_v51, 1  ;;  %v490_v62 = vshll.u32 %v3009_v53, 16  ;;  %v488_v1 = vshrl.u32 %v3009_v53, 16  ;;  %v3040_v13 = vld [vmem:[%s2924_s27 + $0x90] sm:$0xff]  }
  0x1c   : > { %v3015_v55 = vsel %vm354_vm0, %v373_v48, %v377_v49  ;;  %v481_v58 = vor.u32 %v480_v50, %v476_v45  ;;  %v384_v60 = vrot.slane %v382_v54, 1  ;;  %v495_v2 = vshll.u32 %v3020_v61, 16  ;;  %v3043_v14 = vld [vmem:[%s2924_s27 + $0x98] ss:$0 sps:$4 sm:$0x11]   ;;  %v3090_v48 = vld [vmem:[%s2924_s27 + $0x3c] sm:$0xff]  }
  0x1d   : > { %2698 = vmatpush1.bf16.msra.mxu1 %v2768_v23  ;;  %1420 = vmatpush1.bf16.msra.mxu0 %v2768_v23  ;;  %v389_v0 = vrot.slane %v387_v57, 1  ;;  %v492_v7 = vrot.slane %v490_v62, 1  ;;  %v394_v11 = vshll.u32 %v3026_v63, 16  ;;  %v392_v16 = vshrl.u32 %v3026_v63, 16  ;;  %v3056_v23 = vld [vmem:[%s2924_s27 + $0x30] sm:$0xff]   ;;  %v3098_v50 = vld [vmem:[%s2924_s27 + $0xa8] sm:$0xff]  }
  0x1e   : > { %v3036_v4 = vsel %vm354_vm0, %v481_v58, %v485_v59  ;;  %v385_v5 = vor.u32 %v384_v60, %v380_v56  ;;  %v497_v15 = vrot.slane %v495_v2, 1  ;;  %v502_v18 = vshll.u32 %v3040_v13, 16  ;;  %v3063_v27 = vld [vmem:[%s2924_s27 + $0x38] ss:$0 sps:$4 sm:$0x11]  }
  0x1f   : > { %651 = vrot.lane.b32.xlu0 %v2981_v36, %s2873_s5  ;;  %565 = vrot.lane.b32.xlu1 %v3000_v47, %s2873_s5  ;;  %v493_v20 = vor.u32 %v492_v7, %v488_v1  ;;  %v396_v21 = vrot.slane %v394_v11, 1  ;;  %v399_v22 = vshll.u32 %v3033_v3, 16  ;;  %v500_v24 = vshrl.u32 %v3040_v13, 16  ;;  %v3081_v43 = vld [vmem:[%s2924_s27 + $0xa4] ss:$0 sps:$4 sm:$0x11]  }
  0x20   : > { %v3052_v19 = vsel %vm354_vm0, %v385_v5, %v389_v0  ;;  %v507_v26 = vshll.u32 %v3043_v14, 16  ;;  %v504_v28 = vrot.slane %v502_v18, 1  ;;  %v406_v29 = vshll.u32 %v3056_v23, 16  ;;  %v3103_v59 = vld [vmem:[%s2924_s27 + $0x44] ss:$0 sps:$4 sm:$0x11]  }
  0x21   : > { %v3069_v30 = vsel %vm354_vm0, %v493_v20, %v497_v15  ;;  %v397_v31 = vor.u32 %v396_v21, %v392_v16  ;;  %v401_v32 = vrot.slane %v399_v22, 1  ;;  %v404_v38 = vshrl.u32 %v3056_v23, 16  ;;  %v3107_v62 = vld [vmem:[%s2924_s27 + $0xb0] ss:$0 sps:$4 sm:$0x11]   ;;  %v3129_v21 = vld [vmem:[%s2924_s27 + $0x48] sm:$0xff]  }
  0x22   : > { %v509_v34 = vrot.slane %v507_v26, 1  ;;  %v505_v39 = vor.u32 %v504_v28, %v500_v24  ;;  %v408_v40 = vrot.slane %v406_v29, 1  ;;  %v411_v42 = vshll.u32 %v3063_v27, 16  ;;  %v2769_v1 = vld [vmem:[%s4098_s1 + $0x24] ss:$8 sps:$4 sm:$0xff]  }
  0x23   : > { %635 = vrot.lane.b32.xlu0 %v2990_v41, %s2873_s5  ;;  %549 = vrot.lane.b32.xlu1 %v3015_v55, %s2873_s5  ;;  %v514_v45 = vshll.u32 %v3072_v33, 16  ;;  %v3085_v46 = vsel %vm354_vm0, %v397_v31, %v401_v32  ;;  %v512_v51 = vshrl.u32 %v3072_v33, 16  ;;  %v519_v54 = vshll.u32 %v3081_v43, 16  ;;  %v2771_v7 = vld [vmem:[%s4098_s1 + $0x20] ss:$8 sps:$4 sm:$0xff]  }
  0x24   : > { %v3095_v49 = vsel %vm354_vm0, %v505_v39, %v509_v34  ;;  %v409_v56 = vor.u32 %v408_v40, %v404_v38  ;;  %v413_v57 = vrot.slane %v411_v42, 1  ;;  %v418_v60 = vshll.u32 %v3090_v48, 16  ;;  %2683 = vmatprep.subr.bf16.mxu1 %v2769_v1  ;;  %1421 = vmatprep.subr.bf16.mxu0 %v2769_v1  ;;  %v2772_v20 = vld [vmem:[%s4098_s1 + $0x14] ss:$8 sps:$4 sm:$0xff]   ;;  %v2774_v22 = vld [vmem:[%s4098_s1 + $0x10] ss:$8 sps:$4 sm:$0xff]  }
  0x25   : > { %v516_v58 = vrot.slane %v514_v45, 1  ;;  %v526_v0 = vshll.u32 %v3098_v50, 16  ;;  %v521_v2 = vrot.slane %v519_v54, 1  ;;  %v416_v5 = vshrl.u32 %v3090_v48, 16  ;;  %2699 = vmatpush1.bf16.msra.mxu1 %v2771_v7  ;;  %1422 = vmatpush1.bf16.msra.mxu0 %v2771_v7  ;;  %v2775_v29 = vld [vmem:[%s4098_s1 + $0x4] ss:$8 sps:$4 sm:$0xff]  }
  0x26   : > { %v3122_v11 = vsel %vm354_vm0, %v409_v56, %v413_v57  ;;  %v420_v16 = vrot.slane %v418_v60, 1  ;;  %v423_v18 = vshll.u32 %v3103_v59, 16  ;;  %v524_v24 = vshrl.u32 %v3098_v50, 16  ;;  %2684 = vmatprep.subr.bf16.mxu1 %v2772_v20  ;;  %v3144_v31 = vld [vmem:[%s2924_s27 + $0x50] ss:$0 sps:$4 sm:$0x11]   ;;  %1423 = vmatprep.subr.bf16.mxu0 %v2772_v20 }
  0x27   : > { %653 = vrot.lane.b32.xlu0 %v3009_v53, %s2873_s5  ;;  %567 = vrot.lane.b32.xlu1 %v3036_v4, %s2873_s5  ;;  %v517_v15 = vor.u32 %v516_v58, %v512_v51  ;;  %v528_v26 = vrot.slane %v526_v0, 1  ;;  %v531_v28 = vshll.u32 %v3107_v62, 16  ;;  %v430_v32 = vshll.u32 %v3129_v21, 16  ;;  %v2777_v40 = vld [vmem:[%s4098_s1] ss:$8 sps:$4 sm:$0xff]   ;;  %v3156_v42 = vld [vmem:[%s2924_s27 + $0xb4] sm:$0xff]  }
  0x28   : > { %v421_v38 = vor.u32 %v420_v16, %v416_v5  ;;  %v425_v39 = vrot.slane %v423_v18, 1  ;;  %v428_v45 = vshrl.u32 %v3129_v21, 16  ;;  %v2778_v51 = vld [vmem:[%s4098_s1 + $0xf4] ss:$8 sps:$4 sm:$0xff]   ;;  %v435_v58 = vshll.u32 %v3144_v31, 16 }
  0x29   : > { %v3148_v34 = vsel %vm354_vm0, %v517_v15, %v521_v2  ;;  %2700 = vmatpush1.bf16.msra.mxu1 %v2774_v22  ;;  %1424 = vmatpush1.bf16.msra.mxu0 %v2774_v22  ;;  %v529_v54 = vor.u32 %v528_v26, %v524_v24  ;;  %v533_v56 = vrot.slane %v531_v28, 1  ;;  %v432_v57 = vrot.slane %v430_v32, 1  ;;  %v3169_v0 = vld [vmem:[%s2924_s27 + $0xbc] ss:$0 sps:$4 sm:$0x11]   ;;  %v3178_v5 = vld [vmem:[%s2924_s27 + $0x54] sm:$0xff]  }
  0x2a   : > { %2685 = vmatprep.subr.bf16.mxu1 %v2775_v29  ;;  %1425 = vmatprep.subr.bf16.mxu0 %v2775_v29  ;;  %v3166_v60 = vsel %vm354_vm0, %v421_v38, %v425_v39  ;;  %v538_v1 = vshll.u32 %v3156_v42, 16  ;;  %v2780_v2 = vld [vmem:[%s4098_s1 + $0xf0] ss:$8 sps:$4 sm:$0xff]   ;;  %v536_v7 = vshrl.u32 %v3156_v42, 16  ;;  %v2781_v15 = vld [vmem:[%s4098_s1 + $0xe4] ss:$8 sps:$4 sm:$0xff]  }
  0x2b   : > { %637 = vrot.lane.b32.xlu0 %v3026_v63, %s2873_s5  ;;  %551 = vrot.lane.b32.xlu1 %v3052_v19, %s2873_s5  ;;  %v3187_v16 = vsel %vm354_vm0, %v529_v54, %v533_v56  ;;  %v437_v18 = vrot.slane %v435_v58, 1  ;;  %v3190_v20 = vld [vmem:[%s2924_s27 + $0x5c] ss:$0 sps:$4 sm:$0x11]   ;;  %v433_v22 = vor.u32 %v432_v57, %v428_v45  ;;  %v543_v26 = vshll.u32 %v3169_v0, 16  ;;  %v3215_v57 = vld [vmem:[%s2924_s27 + $0xc0] sm:$0xff]  }
  0x2c   : > { %4103 = vst [vmem:[#allocation2_spill] sm:$0xff] %v3187_v16  ;;  %v540_v24 = vrot.slane %v538_v1, 1  ;;  %v442_v28 = vshll.u32 %v3178_v5, 16  ;;  %v2783_v29 = vld [vmem:[%s4098_s1 + $0xe0] ss:$8 sps:$4 sm:$0xff]   ;;  %v440_v38 = vshrl.u32 %v3178_v5, 16 }
  0x2d   : > { %2701 = vmatpush1.bf16.msra.mxu1 %v2777_v40  ;;  %1426 = vmatpush1.bf16.msra.mxu0 %v2777_v40  ;;  %v2784_v32 = vld [vmem:[%s4098_s1 + $0xd4] ss:$8 sps:$4 sm:$0xff]   ;;  %v447_v39 = vshll.u32 %v3190_v20, 16  ;;  %v3207_v40 = vsel %vm354_vm0, %v433_v22, %v437_v18  ;;  %v2786_v56 = vld [vmem:[%s4098_s1 + $0xd0] ss:$8 sps:$4 sm:$0xff]   ;;  %v583_v22 = vrot.slane %v2936_v8, 1 }
  0x2e   : > { %2686 = vmatprep.subr.bf16.mxu1 %v2778_v51  ;;  %1427 = vmatprep.subr.bf16.mxu0 %v2778_v51  ;;  %v541_v45 = vor.u32 %v540_v24, %v536_v7  ;;  %v545_v51 = vrot.slane %v543_v26, 1  ;;  %v444_v54 = vrot.slane %v442_v28, 1  ;;  %v2787_v58 = vld [vmem:[%s4098_s1 + $0xc4] ss:$8 sps:$4 sm:$0xff]   ;;  %v2790_v18 = vld [vmem:[%s4098_s1 + $0xb4] ss:$8 sps:$4 sm:$0xff]  }
  0x2f   : > { %655 = vrot.lane.b32.xlu0 %v3040_v13, %s2873_s5  ;;  %569 = vrot.lane.b32.xlu1 %v3069_v30, %s2873_s5  ;;  %v449_v7 = vrot.slane %v447_v39, 1  ;;  %v584_v24 = vrot.slane %v2984_v37, 1  ;;  %v586_v28 = vrot.slane %v2990_v41, 1  ;;  %v2793_v37 = vld [vmem:[%s4098_s1 + $0xa4] ss:$8 sps:$4 sm:$0xff]   ;;  %v590_v39 = vrot.slane %v3033_v3, 1 }
  0x30   : > { %v3223_v1 = vsel %vm354_vm0, %v541_v45, %v545_v51  ;;  %v592_v51 = vrot.slane %v3056_v23, 1  ;;  %v2796_v3 = vld [vmem:[%s4098_s1 + $0x94] ss:$8 sps:$4 sm:$0xff]  }
  0x31   : > { %2702 = vmatpush2.bf16.msra.mxu1 %v2780_v2  ;;  %1428 = vmatpush2.bf16.msra.mxu0 %v2780_v2  ;;  %4104 = vst [vmem:[#allocation3_spill] sm:$0xff] %v3223_v1  ;;  %v445_v2 = vor.u32 %v444_v54, %v440_v38  ;;  %v3253_v38 = vsel %vm579_vm1, %v583_v22, %v584_v24  ;;  %v593_v54 = vrot.slane %v3063_v27, 1  ;;  %v595_v27 = vrot.slane %v3090_v48, 1  ;;  %v2798_v22 = vld [vmem:[%s4098_s1 + $0x90] ss:$8 sps:$4 sm:$0xff]  }
  0x32   : > { %2687 = vmatprep.subr.bf16.mxu1 %v2781_v15  ;;  %1429 = vmatprep.subr.bf16.mxu0 %v2781_v15  ;;  %v2789_v15 = vld [vmem:[%s4098_s1 + $0xc0] ss:$8 sps:$4 sm:$0xff]  }
  0x33   : > { %639 = vrot.lane.b32.xlu0 %v3056_v23, %s2873_s5  ;;  %553 = vrot.lane.b32.xlu1 %v3085_v46, %s2873_s5  ;;  %v3238_v26 = vsel %vm354_vm0, %v445_v2, %v449_v7  ;;  %v596_v2 = vrot.slane %v3103_v59, 1  ;;  %v3278_v7 = vsel %vm579_vm1, %v592_v51, %v593_v54  ;;  %v2799_v59 = vld [vmem:[%s4098_s1 + $0x84] ss:$8 sps:$4 sm:$0xff]   ;;  %v2807_v51 = vld [vmem:[%s4098_s1 + $0x234] ss:$8 sps:$4 sm:$0xff]   ;;  %v608_v54 = vrot.slane %v2970_v25, 1 }
  0x34   : > { %v3332_v25 = vld [vmem:[%s2924_s27 + $0xcc] sm:$0xff]  }
  0x35   : > { %2703 = vmatpush2.bf16.msra.mxu1 %v2783_v29  ;;  %1430 = vmatpush2.bf16.msra.mxu0 %v2783_v29  ;;  %v587_v29 = vrot.slane %v3004_v52, 1  ;;  %v589_v52 = vrot.slane %v3026_v63, 1  ;;  %v3293_v24 = vsel %vm579_vm1, %v595_v27, %v596_v2  ;;  %v671_v2 = vshll.u32 %v3215_v57, 16 }
  0x36   : > { %2688 = vmatprep.subr.bf16.mxu1 %v2784_v32  ;;  %1431 = vmatprep.subr.bf16.mxu0 %v2784_v32  ;;  %v2792_v32 = vld [vmem:[%s4098_s1 + $0xb0] ss:$8 sps:$4 sm:$0xff]  }
  0x37   : > { %657 = vrot.lane.b32.xlu0 %v3072_v33, %s2873_s5  ;;  %571 = vrot.lane.b32.xlu1 %v3095_v49, %s2873_s5  ;;  %v3258_v45 = vsel %vm579_vm1, %v586_v28, %v587_v29  ;;  %v602_v28 = vrot.slane %v3190_v20, 1  ;;  %v2804_v20 = vld [vmem:[%s4098_s1 + $0x174] ss:$8 sps:$4 sm:$0xff]  }
  0x39   : > { %2704 = vmatpush2.bf16.msra.mxu1 %v2786_v56  ;;  %1432 = vmatpush2.bf16.msra.mxu0 %v2786_v56  ;;  %v2795_v56 = vld [vmem:[%s4098_s1 + $0xa0] ss:$8 sps:$4 sm:$0xff]  }
  0x3a   : > { %2689 = vmatprep.subr.bf16.mxu1 %v2787_v58  ;;  %1433 = vmatprep.subr.bf16.mxu0 %v2787_v58  ;;  %v3273_v58 = vsel %vm579_vm1, %v589_v52, %v590_v39  ;;  %v605_v52 = vrot.slane %v2946_v10, 1  ;;  %v607_v10 = vrot.slane %v2930_v6, 1 }
  0x3b   : > { %641 = vrot.lane.b32.xlu0 %v3090_v48, %s2873_s5  ;;  %555 = vrot.lane.b32.xlu1 %v3122_v11, %s2873_s5 }
  0x3d   : > { %2705 = vmatpush2.bf16.msra.mxu1 %v2789_v15  ;;  %1434 = vmatpush2.bf16.msra.mxu0 %v2789_v15  ;;  %v598_v15 = vrot.slane %v3129_v21, 1 }
  0x3e   : > { %2690 = vmatprep.subr.bf16.mxu1 %v2790_v18  ;;  %1435 = vmatprep.subr.bf16.mxu0 %v2790_v18  ;;  %v599_v18 = vrot.slane %v3144_v31, 1  ;;  %v601_v31 = vrot.slane %v3178_v5, 1 }
  0x3f   : > { %659 = vrot.lane.b32.xlu0 %v3098_v50, %s2873_s5  ;;  %573 = vrot.lane.b32.xlu1 %v3148_v34, %s2873_s5 }
  0x40   : > { %v3298_v29 = vsel %vm579_vm1, %v598_v15, %v599_v18  ;;  %v3313_v39 = vsel %vm579_vm1, %v601_v31, %v602_v28  ;;  %v2862_v15 = vld [vmem:[%s2924_s27 + $0xc8] ss:$0 sps:$4 sm:$0x11]   ;;  %v3335_v18 = vsel %vm579_vm1, %v607_v10, %v608_v54  ;;  %v616_v31 = vrot.slane %v3040_v13, 1 }
  0x41   : > { %2706 = vmatpush2.bf16.msra.mxu1 %v2792_v32  ;;  %1436 = vmatpush2.bf16.msra.mxu0 %v2792_v32  ;;  %v2801_v32 = vld [vmem:[%s4098_s1 + $0x80] ss:$8 sps:$4 sm:$0xff]   ;;  %v617_v28 = vrot.slane %v3043_v14, 1  ;;  %v619_v10 = vrot.slane %v3072_v33, 1  ;;  %v620_v54 = vrot.slane %v3081_v43, 1 }
  0x42   : > { %2691 = vmatprep.subr.bf16.mxu1 %v2793_v37  ;;  %1437 = vmatprep.subr.bf16.mxu0 %v2793_v37  ;;  %v604_v37 = vrot.slane %v2943_v9, 1 }
  0x43   : > { %643 = vrot.lane.b32.xlu0 %v3129_v21, %s2873_s5  ;;  %557 = vrot.lane.b32.xlu1 %v3166_v60, %s2873_s5  ;;  %v3361_v14 = vsel %vm579_vm1, %v616_v31, %v617_v28  ;;  %v626_v28 = vrot.slane %v3169_v0, 1 }
  0x44   : > { %v3323_v27 = vsel %vm579_vm1, %v604_v37, %v605_v52  ;;  %v673_v37 = vrot.slane %v671_v2, 1  ;;  %v676_v52 = vshll.u32 %v2862_v15, 16 }
  0x45   : > { %2707 = vmatpush2.bf16.msra.mxu1 %v2795_v56  ;;  %1438 = vmatpush2.bf16.msra.mxu0 %v2795_v56  ;;  %v610_v56 = vrot.slane %v2981_v36, 1 }
  0x46   : > { %2692 = vmatprep.subr.bf16.mxu1 %v2796_v3  ;;  %1439 = vmatprep.subr.bf16.mxu0 %v2796_v3  ;;  %v611_v3 = vrot.slane %v2995_v44, 1 }
  0x47   : > { %661 = vrot.lane.b32.xlu0 %v3156_v42, %s2873_s5  ;;  %575 = vrot.lane.b32.xlu1 %v3187_v16, %s2873_s5  ;;  %v3370_v16 = vsel %vm579_vm1, %v619_v10, %v620_v54  ;;  %v681_v10 = vrot.slane %v2862_v15, 1  ;;  %v581_v15 = vrot.slane %v2961_v17, 1  ;;  %v2805_v17 = vld [vmem:[%s4098_s1 + $0x230] ss:$8 sps:$4 sm:$0xff]  }
  0x48   : > { %v3338_v44 = vsel %vm579_vm1, %v610_v56, %v611_v3  ;;  %v622_v56 = vrot.slane %v3098_v50, 1  ;;  %v623_v3 = vrot.slane %v3107_v62, 1  ;;  %v625_v62 = vrot.slane %v3156_v42, 1 }
  0x49   : > { %2708 = vmatpush2.bf16.msra.mxu1 %v2798_v22  ;;  %1440 = vmatpush2.bf16.msra.mxu0 %v2798_v22  ;;  %v613_v22 = vrot.slane %v3009_v53, 1 }
  0x4a   : > { %2693 = vmatprep.subr.bf16.mxu1 %v2799_v59  ;;  %1441 = vmatprep.subr.bf16.mxu0 %v2799_v59  ;;  %v614_v59 = vrot.slane %v3020_v61, 1  ;;  %v3375_v31 = vsel %vm579_vm1, %v622_v56, %v623_v3  ;;  %v3386_v54 = vsel %vm579_vm1, %v625_v62, %v626_v28  ;;  %v2802_v62 = vld [vmem:[%s4098_s1 + $0x170] ss:$8 sps:$4 sm:$0xff]  }
  0x4b   : > { %645 = vrot.lane.b32.xlu0 %v3178_v5, %s2873_s5  ;;  %559 = vrot.lane.b32.xlu1 %v3207_v40, %s2873_s5 }
  0x4c   : > { %v3354_v61 = vsel %vm579_vm1, %v613_v22, %v614_v59  ;;  %v678_v22 = vrot.slane %v676_v52, 1  ;;  %v724_v59 = vshrl.u32 %v3332_v25, 16 }
  0x4d   : > { %2709 = vmatpush2.bf16.msra.mxu1 %v2801_v32  ;;  %1442 = vmatpush2.bf16.msra.mxu0 %v2801_v32  ;;  %v669_v32 = vshrl.u32 %v3215_v57, 16 }
  0x4e   : > { %1604 = vmatprep.subr.bf16.mxu1 %v2804_v20  ;;  %1805 = vmatprep.subr.bf16.mxu0 %v2807_v51  ;;  %v3350_v20 = vld [vmem:[%s2924_s27 + $0xd4] ss:$0 sps:$4 sm:$0x11]   ;;  %v726_v51 = vshll.u32 %v3332_v25, 16 }
  0x4f   : > { %663 = vrot.lane.b32.xlu0 %v3215_v57, %s2873_s5  ;;  %577 = vrot.lane.b32.xlu1 %v3223_v1, %s2873_s5  ;;  %v674_v2 = vor.u32 %v673_v37, %v669_v32  ;;  %v731_v43 = vshll.u32 %v3350_v20, 16 }
  0x50   : > { %v728_v1 = vrot.slane %v726_v51, 1  ;;  %v680_v51 = vrot.slane %v3215_v57, 1 }
  0x51   : > { %v3382_v32 = vsel %vm354_vm0, %v674_v2, %v678_v22  ;;  %v733_v52 = vrot.slane %v731_v43, 1 }
  0x52   : > { %v729_v37 = vor.u32 %v728_v1, %v724_v59  ;;  %v3394_v56 = vsel %vm579_vm1, %v680_v51, %v681_v10  ;;  %v580_v1 = vrot.slane %v2952_v12, 1  ;;  %v2822_v10 = vld [vmem:[%s4098_s1 + $0x224] ss:$8 sps:$4 sm:$0xff]  }
  0x53   : > { %647 = vrot.lane.b32.xlu0 %v2943_v9, %s2873_s5  ;;  %561 = vrot.lane.b32.xlu1 %v3238_v26, %s2873_s5 }
  0x54   : > { %v734_v0 = vsel %vm354_vm0, %v729_v37, %v733_v52  ;;  %v582_v3 = vsel %vm579_vm1, %v580_v1, %v581_v15  ;;  %v2810_v37 = vld [vmem:[%s4098_s1 + $0x164] ss:$8 sps:$4 sm:$0xff]   ;;  %v2808_v1 = vld [vmem:[%s4098_s1 + $0x160] ss:$8 sps:$4 sm:$0xff]  }
  0x57   : > { %683 = vrot.lane.b32.xlu0 %v3253_v38, %s2873_s5  ;;  %685 = vrot.lane.b32.xlu1 %v3258_v45, %s2873_s5 }
  0x5b   : > { %687 = vrot.lane.b32.xlu0 %v3273_v58, %s2873_s5  ;;  %689 = vrot.lane.b32.xlu1 %v3278_v7, %s2873_s5 }
  0x5f   : > { %691 = vrot.lane.b32.xlu0 %v3293_v24, %s2873_s5  ;;  %693 = vrot.lane.b32.xlu1 %v3298_v29, %s2873_s5 }
  0x63   : > { %695 = vrot.lane.b32.xlu0 %v3313_v39, %s2873_s5  ;;  %697 = vrot.lane.b32.xlu1 %v3323_v27, %s2873_s5 }
  0x67   : > { %699 = vrot.lane.b32.xlu0 %v3335_v18, %s2873_s5  ;;  %701 = vrot.lane.b32.xlu1 %v3338_v44, %s2873_s5 }
  0x6b   : > { %703 = vrot.lane.b32.xlu0 %v3354_v61, %s2873_s5  ;;  %705 = vrot.lane.b32.xlu1 %v3361_v14, %s2873_s5 }
  0x6f   : > { %707 = vrot.lane.b32.xlu0 %v3370_v16, %s2873_s5  ;;  %709 = vrot.lane.b32.xlu1 %v3375_v31, %s2873_s5 }
  0x73   : > { %735 = vrot.lane.b32.xlu0 %v3382_v32, %s2873_s5  ;;  %711 = vrot.lane.b32.xlu1 %v3386_v54, %s2873_s5 }
  0x77   : > { %737 = vrot.lane.b32.xlu0 %v734_v0, %s2873_s5  ;;  %713 = vrot.lane.b32.xlu1 %v3394_v56, %s2873_s5 }
  0x84   : > { %v650_v2 = vpop.permute.xlu0 %649 }
  0x85   : > { %v634_v22 = vpop.permute.xlu1 %633  ;;  %v825_v59 = vsel %vm742_vm2, %v3323_v27, %v650_v2 }
  0x86   : > { %1523 = vmatprep.mubr.bf16.mxu1 %v825_v59  ;;  %v793_v43 = vsel %vm742_vm2, %v582_v3, %v634_v22  ;;  %v2820_v3 = vld [vmem:[%s4098_s1 + $0x220] ss:$8 sps:$4 sm:$0xff]   ;;  %v2837_v22 = vld [vmem:[%s4098_s1 + $0x214] ss:$8 sps:$4 sm:$0xff]   ;;  %v2811_v59 = vld [vmem:[%s4098_s1 + $0x150] ss:$8 sps:$4 sm:$0xff]  }
  0x87   : > { %1443 = vmatprep.mubr.bf16.mxu0 %v793_v43 }
  0x8d   : > { %v564_v28 = vpop.permute.xlu0 %563  ;;  %v548_v52 = vpop.permute.xlu1 %547 }
  0x8e   : > { %v3416_v51 = vsel %vm742_vm2, %v2943_v9, %v564_v28  ;;  %v744_v0 = vsel %vm742_vm2, %v2952_v12, %v548_v52  ;;  %v2813_v9 = vld [vmem:[%s4098_s1 + $0x154] ss:$8 sps:$4 sm:$0xff]   ;;  %v2835_v28 = vld [vmem:[%s4098_s1 + $0x210] ss:$8 sps:$4 sm:$0xff]  }
  0x8f   : > { %1524 = vmatmul.mubr.bf16.vlgmr.msra.gmra.mxu1 %v3416_v51  ;;  %1444 = vmatmul.mubr.bf16.vlgmr.msra.gmra.mxu0 %v744_v0 }
  0x90   : > { %1605 = vmatpush1.bf16.msra.mxu1 %v2802_v62  ;;  %1806 = vmatpush1.bf16.msra.mxu0 %v2805_v17  ;;  %v2816_v62 = vld [vmem:[%s4098_s1 + $0x144] ss:$8 sps:$4 sm:$0xff]  }
  0x91   : > { %v652_v15 = vpop.permute.xlu0 %651  ;;  %1606 = vmatprep.subr.bf16.mxu1 %v2810_v37  ;;  %v566_v12 = vpop.permute.xlu1 %565  ;;  %1807 = vmatprep.subr.bf16.mxu0 %v2822_v10  ;;  %v2852_v10 = vld [vmem:[%s4098_s1 + $0x204] ss:$8 sps:$4 sm:$0xff]  }
  0x92   : > { %v829_v2 = vsel %vm742_vm2, %v3335_v18, %v652_v15  ;;  %v3451_v52 = vsel %vm742_vm2, %v2930_v6, %v566_v12  ;;  %v2819_v6 = vld [vmem:[%s4098_s1 + $0x134] ss:$8 sps:$4 sm:$0xff]   ;;  %v2850_v15 = vld [vmem:[%s4098_s1 + $0x200] ss:$8 sps:$4 sm:$0xff]  }
  0x93   : > { %1533 = vmatprep.mubr.bf16.mxu1 %v829_v2  ;;  %v2825_v2 = vld [vmem:[%s4098_s1 + $0x124] ss:$8 sps:$4 sm:$0xff]  }
  0x94   : > { %1607 = vmatpush1.bf16.msra.mxu1 %v2808_v1  ;;  %1808 = vmatpush1.bf16.msra.mxu0 %v2820_v3  ;;  %v2817_v3 = vld [vmem:[%s4098_s1 + $0x130] ss:$8 sps:$4 sm:$0xff]  }
  0x95   : > { %v636_v43 = vpop.permute.xlu0 %635  ;;  %1608 = vmatprep.subr.bf16.mxu1 %v2813_v9  ;;  %v550_v17 = vpop.permute.xlu1 %549  ;;  %1809 = vmatprep.subr.bf16.mxu0 %v2837_v22 }
  0x96   : > { %v797_v37 = vsel %vm742_vm2, %v3253_v38, %v636_v43  ;;  %v747_v0 = vsel %vm742_vm2, %v2936_v8, %v550_v17  ;;  %v2814_v38 = vld [vmem:[%s4098_s1 + $0x140] ss:$8 sps:$4 sm:$0xff]  }
  0x97   : > { %1453 = vmatprep.mubr.bf16.mxu0 %v797_v37  ;;  %1534 = vmatmul.mubr.bf16.gmra.mxu1 %v3451_v52 }
  0x98   : > { %1609 = vmatpush1.bf16.msra.mxu1 %v2811_v59  ;;  %1454 = vmatmul.mubr.bf16.gmra.mxu0 %v747_v0 }
  0x99   : > { %v654_v1 = vpop.permute.xlu0 %653  ;;  %1610 = vmatprep.subr.bf16.mxu1 %v2816_v62  ;;  %1810 = vmatpush1.bf16.msra.mxu0 %v2835_v28  ;;  %v568_v9 = vpop.permute.xlu1 %567  ;;  %v2823_v28 = vld [vmem:[%s4098_s1 + $0x120] ss:$8 sps:$4 sm:$0xff]  }
  0x9a   : > { %v833_v8 = vsel %vm742_vm2, %v3338_v44, %v654_v1  ;;  %1811 = vmatprep.subr.bf16.mxu0 %v2852_v10  ;;  %v3480_v43 = vsel %vm742_vm2, %v2981_v36, %v568_v9  ;;  %v2828_v36 = vld [vmem:[%s4098_s1 + $0x114] ss:$8 sps:$4 sm:$0xff]  }
  0x9b   : > { %1543 = vmatprep.mubr.bf16.mxu1 %v833_v8  ;;  %v2829_v8 = vld [vmem:[%s4098_s1 + $0x100] ss:$8 sps:$4 sm:$0xff]  }
  0x9c   : > { %1611 = vmatpush1.bf16.msra.mxu1 %v2814_v38  ;;  %v2831_v38 = vld [vmem:[%s4098_s1 + $0x104] ss:$8 sps:$4 sm:$0xff]  }
  0x9d   : > { %v638_v12 = vpop.permute.xlu0 %637  ;;  %1612 = vmatprep.subr.bf16.mxu1 %v2819_v6  ;;  %1812 = vmatpush1.bf16.msra.mxu0 %v2850_v15  ;;  %v552_v22 = vpop.permute.xlu1 %551 }
  0x9e   : > { %v801_v59 = vsel %vm742_vm2, %v3258_v45, %v638_v12  ;;  %v3485_v62 = vsel %vm742_vm2, %v2990_v41, %v552_v22  ;;  %v2826_v41 = vld [vmem:[%s4098_s1 + $0x110] ss:$8 sps:$4 sm:$0xff]  }
  0x9f   : > { %1463 = vmatprep.mubr.bf16.mxu0 %v801_v59  ;;  %1544 = vmatmul.mubr.bf16.gmra.mxu1 %v3480_v43  ;;  %v2840_v59 = vld [vmem:[%s4098_s1 + $0x1e4] ss:$8 sps:$4 sm:$0xff]  }
  0xa0   : > { %1613 = vmatpush1.bf16.msra.mxu1 %v2817_v3  ;;  %1464 = vmatmul.mubr.bf16.gmra.mxu0 %v3485_v62 }
  0xa1   : > { %v656_v17 = vpop.permute.xlu0 %655  ;;  %1614 = vmatprep.subr.bf16.mxu1 %v2825_v2  ;;  %v570_v37 = vpop.permute.xlu1 %569 }
  0xa2   : > { %v837_v10 = vsel %vm742_vm2, %v3354_v61, %v656_v17  ;;  %v3506_v15 = vsel %vm742_vm2, %v3009_v53, %v570_v37  ;;  %v2834_v53 = vld [vmem:[%s4098_s1 + $0x1f4] ss:$8 sps:$4 sm:$0xff]  }
  0xa3   : > { %1553 = vmatprep.mubr.bf16.mxu1 %v837_v10  ;;  %v2838_v10 = vld [vmem:[%s4098_s1 + $0x1e0] ss:$8 sps:$4 sm:$0xff]  }
  0xa4   : > { %1615 = vmatpush1.bf16.msra.mxu1 %v2823_v28 }
  0xa5   : > { %v640_v0 = vpop.permute.xlu0 %639  ;;  %1616 = vmatprep.subr.bf16.mxu1 %v2828_v36  ;;  %v554_v1 = vpop.permute.xlu1 %553 }
  0xa6   : > { %v805_v6 = vsel %vm742_vm2, %v3273_v58, %v640_v0  ;;  %v3511_v9 = vsel %vm742_vm2, %v3026_v63, %v554_v1  ;;  %v2832_v63 = vld [vmem:[%s4098_s1 + $0x1f0] ss:$8 sps:$4 sm:$0xff]  }
  0xa7   : > { %1473 = vmatprep.mubr.bf16.mxu0 %v805_v6  ;;  %1554 = vmatmul.mubr.bf16.gmra.mxu1 %v3506_v15  ;;  %v2846_v6 = vld [vmem:[%s4098_s1 + $0x1c4] ss:$8 sps:$4 sm:$0xff]  }
  0xa8   : > { %1617 = vmatpush1.bf16.msra.mxu1 %v2826_v41  ;;  %1474 = vmatmul.mubr.bf16.gmra.mxu0 %v3511_v9 }
  0xa9   : > { %v658_v3 = vpop.permute.xlu0 %657  ;;  %1618 = vmatprep.subr.bf16.mxu1 %v2831_v38  ;;  %v572_v12 = vpop.permute.xlu1 %571 }
  0xaa   : > { %v841_v2 = vsel %vm742_vm2, %v3361_v14, %v658_v3  ;;  %v3532_v36 = vsel %vm742_vm2, %v3040_v13, %v572_v12  ;;  %v2843_v13 = vld [vmem:[%s4098_s1 + $0x1d4] ss:$8 sps:$4 sm:$0xff]  }
  0xab   : > { %1563 = vmatprep.mubr.bf16.mxu1 %v841_v2  ;;  %v2844_v2 = vld [vmem:[%s4098_s1 + $0x1c0] ss:$8 sps:$4 sm:$0xff]  }
  0xac   : > { %1619 = vmatpush1.bf16.msra.mxu1 %v2829_v8 }
  0xad   : > { %v642_v22 = vpop.permute.xlu0 %641  ;;  %1620 = vmatprep.subr.bf16.mxu1 %v2834_v53  ;;  %v556_v28 = vpop.permute.xlu1 %555 }
  0xae   : > { %v809_v17 = vsel %vm742_vm2, %v3278_v7, %v642_v22  ;;  %v3537_v37 = vsel %vm742_vm2, %v3056_v23, %v556_v28  ;;  %v2841_v23 = vld [vmem:[%s4098_s1 + $0x1d0] ss:$8 sps:$4 sm:$0xff]  }
  0xaf   : > { %1483 = vmatprep.mubr.bf16.mxu0 %v809_v17  ;;  %1564 = vmatmul.mubr.bf16.gmra.mxu1 %v3532_v36  ;;  %v2855_v17 = vld [vmem:[%s4098_s1 + $0x1a4] ss:$8 sps:$4 sm:$0xff]  }
  0xb0   : > { %1621 = vmatpush2.bf16.msra.mxu1 %v2832_v63  ;;  %1484 = vmatmul.mubr.bf16.gmra.mxu0 %v3537_v37 }
  0xb1   : > { %v660_v41 = vpop.permute.xlu0 %659  ;;  %1622 = vmatprep.subr.bf16.mxu1 %v2840_v59  ;;  %v574_v0 = vpop.permute.xlu1 %573 }
  0xb2   : > { %v845_v38 = vsel %vm742_vm2, %v3370_v16, %v660_v41  ;;  %v3558_v53 = vsel %vm742_vm2, %v3072_v33, %v574_v0  ;;  %v2849_v33 = vld [vmem:[%s4098_s1 + $0x1b4] ss:$8 sps:$4 sm:$0xff]  }
  0xb3   : > { %1573 = vmatprep.mubr.bf16.mxu1 %v845_v38  ;;  %v2853_v38 = vld [vmem:[%s4098_s1 + $0x1a0] ss:$8 sps:$4 sm:$0xff]  }
  0xb4   : > { %1623 = vmatpush2.bf16.msra.mxu1 %v2838_v10 }
  0xb5   : > { %v644_v1 = vpop.permute.xlu0 %643  ;;  %1624 = vmatprep.subr.bf16.mxu1 %v2843_v13  ;;  %v558_v8 = vpop.permute.xlu1 %557 }
  0xb6   : > { %v813_v3 = vsel %vm742_vm2, %v3293_v24, %v644_v1  ;;  %v3563_v12 = vsel %vm742_vm2, %v3090_v48, %v558_v8  ;;  %v2847_v48 = vld [vmem:[%s4098_s1 + $0x1b0] ss:$8 sps:$4 sm:$0xff]   ;;  %v2858_v1 = vld [vmem:[%s4098_s1 + $0x194] ss:$8 sps:$4 sm:$0xff]  }
  0xb7   : > { %1493 = vmatprep.mubr.bf16.mxu0 %v813_v3  ;;  %1574 = vmatmul.mubr.bf16.gmra.mxu1 %v3558_v53  ;;  %v2861_v3 = vld [vmem:[%s4098_s1 + $0x184] ss:$8 sps:$4 sm:$0xff]  }
  0xb8   : > { %1625 = vmatpush2.bf16.msra.mxu1 %v2841_v23  ;;  %1494 = vmatmul.mubr.bf16.gmra.mxu0 %v3563_v12 }
  0xb9   : > { %v662_v63 = vpop.permute.xlu0 %661  ;;  %1626 = vmatprep.subr.bf16.mxu1 %v2846_v6  ;;  %v576_v22 = vpop.permute.xlu1 %575 }
  0xba   : > { %v849_v59 = vsel %vm742_vm2, %v3375_v31, %v662_v63  ;;  %v3584_v13 = vsel %vm742_vm2, %v3098_v50, %v576_v22 }
  0xbb   : > { %1583 = vmatprep.mubr.bf16.mxu1 %v849_v59  ;;  %v2859_v59 = vld [vmem:[%s4098_s1 + $0x180] ss:$8 sps:$4 sm:$0xff]  }
  0xbc   : > { %1627 = vmatpush2.bf16.msra.mxu1 %v2844_v2 }
  0xbd   : > { %v646_v28 = vpop.permute.xlu0 %645  ;;  %1628 = vmatprep.subr.bf16.mxu1 %v2849_v33  ;;  %v560_v10 = vpop.permute.xlu1 %559 }
  0xbe   : > { %v817_v41 = vsel %vm742_vm2, %v3298_v29, %v646_v28  ;;  %v762_v0 = vsel %vm742_vm2, %v3129_v21, %v560_v10  ;;  %v2856_v21 = vld [vmem:[%s4098_s1 + $0x190] ss:$8 sps:$4 sm:$0xff]   ;;  %v2874_v28 = vmov 0  }
  0xbf   : > { %1503 = vmatprep.mubr.bf16.mxu0 %v817_v41  ;;  %1584 = vmatmul.mubr.bf16.gmra.mxu1 %v3584_v13 }
  0xc0   : > { %1629 = vmatpush2.bf16.msra.mxu1 %v2847_v48  ;;  %1504 = vmatmul.mubr.bf16.gmra.mxu0 %v762_v0 }
  0xc1   : > { %v664_v23 = vpop.permute.xlu0 %663  ;;  %1630 = vmatprep.subr.bf16.mxu1 %v2855_v17  ;;  %v578_v50 = vpop.permute.xlu1 %577 }
  0xc2   : > { %v853_v6 = vsel %vm742_vm2, %v3386_v54, %v664_v23  ;;  %v3607_v33 = vsel %vm742_vm2, %v3156_v42, %v578_v50 }
  0xc3   : > { %1593 = vmatprep.mubr.bf16.mxu1 %v853_v6 }
  0xc4   : > { %1631 = vmatpush2.bf16.msra.mxu1 %v2853_v38 }
  0xc5   : > { %v648_v8 = vpop.permute.xlu0 %647  ;;  %1632 = vmatprep.subr.bf16.mxu1 %v2858_v1  ;;  %v562_v2 = vpop.permute.xlu1 %561 }
  0xc6   : > { %v821_v63 = vsel %vm742_vm2, %v3313_v39, %v648_v8  ;;  %v765_v22 = vsel %vm742_vm2, %v3178_v5, %v562_v2 }
  0xc7   : > { %1513 = vmatprep.mubr.bf16.mxu0 %v821_v63  ;;  %1594 = vmatmul.mubr.bf16.gmra.mxu1 %v3607_v33 }
  0xc8   : > { %1633 = vmatpush2.bf16.msra.mxu1 %v2856_v21  ;;  %1514 = vmatmul.mubr.bf16.gmra.mxu0 %v765_v22 }
  0xc9   : > { %1636 = vmatprep.mubr.bf16.mxu1 %v3485_v62  ;;  %1634 = vmatprep.subr.bf16.mxu1 %v2861_v3  ;;  %v684_v48 = vpop.permute.xlu0 %683  ;;  %v686_v5 = vpop.permute.xlu1 %685 }
  0xca   : > { %1829 = vmatprep.mubr.bf16.mxu0 %v2874_v28  ;;  %v857_v42 = vsel %vm742_vm2, %v3015_v55, %v684_v48  ;;  %v861_v62 = vsel %vm742_vm2, %v3052_v19, %v686_v5 }
  0xcc   : > { %1635 = vmatpush2.bf16.msra.mxu1 %v2859_v59 }
  0xcd   : > { %v688_v17 = vpop.permute.xlu0 %687 }
  0xce   : > { %v865_v55 = vsel %vm742_vm2, %v3085_v46, %v688_v17 }
  0xcf   : > { %1637 = vmatmul.mubr.bf16.vlgmr.msra.gmra.mxu1 %v857_v42 }
  0xd0   : > { %1646 = vmatprep.mubr.bf16.mxu1 %v3511_v9  ;;  %2595 = vmatmul.mubr.msk.bf16.vlgmr.msra.gmra.mxu0 %vm742_vm2, %v3258_v45  ;;  %v690_v45 = vpop.permute.xlu1 %689  ;;  %v999_v9 = vlaneseq }
  0xd1   : > { %1839 = vmatprep.mubr.bf16.mxu0 %v2874_v28  ;;  %v869_v19 = vsel %vm742_vm2, %v3122_v11, %v690_v45 }
  0xd7   : > { %1647 = vmatmul.mubr.bf16.gmra.mxu1 %v861_v62 }
  0xd8   : > { %1656 = vmatprep.mubr.bf16.mxu1 %v3537_v37  ;;  %2596 = vmatmul.mubr.msk.bf16.gmra.mxu0 %vm742_vm2, %v3273_v58  ;;  %v692_v58 = vpop.permute.xlu0 %691  ;;  %v739_v37 = vrot.slane %v3332_v25, 1 }
  0xd9   : > { %1849 = vmatprep.mubr.bf16.mxu0 %v2874_v28  ;;  %v873_v46 = vsel %vm742_vm2, %v3166_v60, %v692_v58 }
  0xdf   : > { %1657 = vmatmul.mubr.bf16.gmra.mxu1 %v865_v55 }
  0xe0   : > { %1666 = vmatprep.mubr.bf16.mxu1 %v3563_v12  ;;  %2597 = vmatmul.mubr.msk.bf16.gmra.mxu0 %vm742_vm2, %v3278_v7  ;;  %v694_v7 = vpop.permute.xlu1 %693 }
  0xe1   : > { %1859 = vmatprep.mubr.bf16.mxu0 %v2874_v28  ;;  %v877_v11 = vsel %vm742_vm2, %v3207_v40, %v694_v7 }
  0xe7   : > { %1667 = vmatmul.mubr.bf16.gmra.mxu1 %v869_v19 }
  0xe8   : > { %1676 = vmatprep.mubr.bf16.mxu1 %v762_v0  ;;  %2598 = vmatmul.mubr.msk.bf16.gmra.mxu0 %vm742_vm2, %v3293_v24  ;;  %v696_v24 = vpop.permute.xlu0 %695 }
  0xe9   : > { %1869 = vmatprep.mubr.bf16.mxu0 %v2874_v28  ;;  %v881_v60 = vsel %vm742_vm2, %v3238_v26, %v696_v24 }
  0xef   : > { %1677 = vmatmul.mubr.bf16.gmra.mxu1 %v873_v46 }
  0xf0   : > { %1686 = vmatprep.mubr.bf16.mxu1 %v765_v22  ;;  %2599 = vmatmul.mubr.msk.bf16.gmra.mxu0 %vm742_vm2, %v3298_v29  ;;  %v698_v29 = vpop.permute.xlu1 %697 }
  0xf1   : > { %1879 = vmatprep.mubr.bf16.mxu0 %v2874_v28  ;;  %v885_v40 = vsel %vm742_vm2, %v2978_v35, %v698_v29 }
  0xf7   : > { %1687 = vmatmul.mubr.bf16.gmra.mxu1 %v877_v11 }
  0xf8   : > { %1696 = vmatprep.mubr.bf16.mxu1 %v3416_v51  ;;  %2600 = vmatmul.mubr.msk.bf16.gmra.mxu0 %vm742_vm2, %v3313_v39  ;;  %v700_v39 = vpop.permute.xlu0 %699  ;;  %v4105_v51 = vld [vmem:[#allocation2_spill] sm:$0xff] }
  0xf9   : > { %1889 = vmatprep.mubr.bf16.mxu0 %v2874_v28  ;;  %v889_v26 = vsel %vm742_vm2, %v3000_v47, %v700_v39 }
  0xff   : > { %1697 = vmatmul.mubr.bf16.gmra.mxu1 %v881_v60 }
 0x100   : > { %1706 = vmatprep.mubr.bf16.mxu1 %v3451_v52  ;;  %2601 = vmatmul.mubr.msk.bf16.gmra.mxu0 %vm742_vm2, %v3323_v27  ;;  %v702_v27 = vpop.permute.xlu1 %701 }
 0x101   : > { %1899 = vmatprep.mubr.bf16.mxu0 %v2874_v28  ;;  %v893_v35 = vsel %vm742_vm2, %v3036_v4, %v702_v27 }
 0x107   : > { %1707 = vmatmul.mubr.bf16.gmra.mxu1 %v885_v40 }
 0x108   : > { %1716 = vmatprep.mubr.bf16.mxu1 %v3480_v43  ;;  %2602 = vmatmul.mubr.msk.bf16.gmra.mxu0 %vm742_vm2, %v3335_v18  ;;  %v704_v18 = vpop.permute.xlu0 %703 }
 0x109   : > { %1909 = vmatprep.mubr.bf16.mxu0 %v2874_v28  ;;  %v897_v47 = vsel %vm742_vm2, %v3069_v30, %v704_v18 }
 0x10f   : > { %1717 = vmatmul.mubr.bf16.gmra.mxu1 %v889_v26 }
 0x110   : > { %1726 = vmatprep.mubr.bf16.mxu1 %v3506_v15  ;;  %2603 = vmatmul.mubr.msk.bf16.gmra.mxu0 %vm742_vm2, %v3338_v44  ;;  %v706_v44 = vpop.permute.xlu1 %705 }
 0x111   : > { %1919 = vmatprep.mubr.bf16.mxu0 %v2874_v28  ;;  %v901_v4 = vsel %vm742_vm2, %v3095_v49, %v706_v44 }
 0x117   : > { %1727 = vmatmul.mubr.bf16.gmra.mxu1 %v893_v35 }
 0x118   : > { %1736 = vmatprep.mubr.bf16.mxu1 %v3532_v36  ;;  %2604 = vmatmul.mubr.msk.bf16.gmra.mxu0 %vm742_vm2, %v3354_v61  ;;  %v708_v61 = vpop.permute.xlu0 %707 }
 0x119   : > { %1929 = vmatprep.mubr.bf16.mxu0 %v2874_v28  ;;  %v905_v30 = vsel %vm742_vm2, %v3148_v34, %v708_v61 }
 0x11c   : > { %v736_v49 = vpop.permute.xlu0 %735 }
 0x11f   : > { %1737 = vmatmul.mubr.bf16.gmra.mxu1 %v897_v47 }
 0x120   : > { %1746 = vmatprep.mubr.bf16.mxu1 %v3558_v53  ;;  %2605 = vmatmul.mubr.msk.bf16.gmra.mxu0 %vm742_vm2, %v3361_v14  ;;  %v710_v14 = vpop.permute.xlu1 %709  ;;  %v738_v43 = vpop.permute.xlu0 %737  ;;  %v740_v53 = vrot.slane %v3350_v20, 1 }
 0x121   : > { %1939 = vmatprep.mubr.bf16.mxu0 %v2874_v28  ;;  %v909_v52 = vsel %vm742_vm2, %v4105_v51, %v710_v14  ;;  %v923_v36 = vsel %vm742_vm2, %v3332_v25, %v738_v43 }
 0x122   : > { %v741_v41 = vsel %vm579_vm1, %v739_v37, %v740_v53 }
 0x124   : > { %v712_v34 = vpop.permute.xlu1 %711 }
 0x127   : > { %1747 = vmatmul.mubr.bf16.gmra.mxu1 %v901_v4 }
 0x128   : > { %1756 = vmatprep.mubr.bf16.mxu1 %v3584_v13  ;;  %2606 = vmatmul.mubr.msk.bf16.gmra.mxu0 %vm742_vm2, %v3370_v16  ;;  %v920_v16 = vsel %vm742_vm2, %v3215_v57, %v736_v49  ;;  %v3706_v57 = vshrl.u32 %v999_v9, 7 }
 0x129   : > { %1949 = vmatprep.mubr.bf16.mxu0 %v2874_v28 }
 0x12a   : > { %v1001_v10 = vsub.s32 0, %v3706_v57  ;;  %v1005_v13 = vsub.s32 2, %v3706_v57 }
 0x12f   : > { %1757 = vmatmul.mubr.bf16.gmra.mxu1 %v905_v30 }
 0x130   : > { %1766 = vmatprep.mubr.bf16.mxu1 %v3607_v33  ;;  %2607 = vmatmul.mubr.msk.bf16.gmra.mxu0 %vm742_vm2, %v3375_v31  ;;  %v4106_v31 = vld [vmem:[#allocation3_spill] sm:$0xff] }
 0x131   : > { %1959 = vmatprep.mubr.bf16.mxu0 %v2874_v28  ;;  %v913_v15 = vsel %vm742_vm2, %v4106_v31, %v712_v34 }
 0x137   : > { %1767 = vmatmul.mubr.bf16.gmra.mxu1 %v909_v52 }
 0x138   : > { %2608 = vmatmul.mubr.msk.bf16.gmra.mxu0 %vm742_vm2, %v3386_v54  ;;  %1776 = vmatprep.mubr.bf16.mxu1 %v920_v16  ;;  %v714_v54 = vpop.permute.xlu1 %713 }
 0x139   : > { %1969 = vmatprep.mubr.bf16.mxu0 %v2874_v28  ;;  %v917_v12 = vsel %vm742_vm2, %v3382_v32, %v714_v54 }
 0x13f   : > { %1777 = vmatmul.mubr.bf16.gmra.mxu1 %v913_v15 }
 0x140   : > { %2609 = vmatmul.mubr.msk.bf16.gmra.mxu0 %vm742_vm2, %v3394_v56  ;;  %1786 = vmatprep.mubr.bf16.mxu1 %v923_v36  ;;  %v3718_v56 = vld [vmem:[%s4099_s2] sm:$0xf] }
 0x141   : > { %1979 = vmatprep.mubr.bf16.mxu0 %v2874_v28  ;;  %v1002_v25 = vrot.slane %v3718_v56, %v1001_v10  ;;  %v1006_v20 = vrot.slane %v3718_v56, %v1005_v13 }
 0x143   : > { %v3724_v0 = vrot.slane %v1002_v25, %v1001_v10  ;;  %v3726_v32 = vrot.slane %v1006_v20, %v1001_v10 }
 0x147   : > { %1787 = vmatmul.mubr.bf16.gmra.mxu1 %v917_v12 }
 0x148   : > { %2610 = vmatmul.mubr.msk.bf16.gmra.mxu0 %vm742_vm2, %v741_v41 }
 0x14f   : > { %v1525_v38 = vpop.f32.mrf.mxu1  ;;  %v3728_v23 = vpop.f32.mrf.mxu0 }
 0x150   : > { %v3731_v1 = vadd.f32 %v1525_v38, %v3724_v0 }
 0x151   : > { %v1527_v50 = vpop.f32.mrf.mxu1  ;;  %v3733_v6 = vpop.f32.mrf.mxu0 }
 0x152   : > { %v3736_v21 = vadd.f32 %v1527_v50, %v3726_v32 }
 0x153   : > { %v1529_v8 = vpop.f32.mrf.mxu1  ;;  %v3738_v3 = vpop.f32.mrf.mxu0 }
 0x154   : > { %v3741_v2 = vadd.f32 %v1529_v8, %v3724_v0 }
 0x155   : > { %v1531_v63 = vpop.f32.mrf.mxu1  ;;  %v3743_v33 = vpop.f32.mrf.mxu0 }
 0x156   : > { %v3746_v22 = vadd.f32 %v1531_v63, %v3726_v32 }
 0x157   : > { %v1535_v59 = vpop.f32.mrf.mxu1 }
 0x158   : > { %v3749_v48 = vadd.f32 %v1535_v59, %v3724_v0  ;;  %v3751_v28 = vpop.f32.mrf.mxu0 }
 0x159   : > { %v1537_v42 = vpop.f32.mrf.mxu1 }
 0x15a   : > { %v3754_v5 = vadd.f32 %v1537_v42, %v3726_v32  ;;  %v3756_v62 = vpop.f32.mrf.mxu0 }
 0x15b   : > { %v1539_v17 = vpop.f32.mrf.mxu1 }
 0x15c   : > { %v3759_v55 = vadd.f32 %v1539_v17, %v3724_v0  ;;  %v3761_v45 = vpop.f32.mrf.mxu0 }
 0x15d   : > { %v1541_v19 = vpop.f32.mrf.mxu1 }
 0x15e   : > { %v3764_v58 = vadd.f32 %v1541_v19, %v3726_v32  ;;  %v3766_v46 = vpop.f32.mrf.mxu0 }
 0x15f   : > { %v1545_v7 = vpop.f32.mrf.mxu1 }
 0x160   : > { %v3769_v11 = vadd.f32 %v1545_v7, %v3724_v0  ;;  %v3771_v24 = vpop.f32.mrf.mxu0 }
 0x161   : > { %v1547_v60 = vpop.f32.mrf.mxu1 }
 0x162   : > { %v3774_v29 = vadd.f32 %v1547_v60, %v3726_v32  ;;  %v3776_v40 = vpop.f32.mrf.mxu0 }
 0x163   : > { %v1549_v39 = vpop.f32.mrf.mxu1 }
 0x164   : > { %v3779_v26 = vadd.f32 %v1549_v39, %v3724_v0  ;;  %v3781_v27 = vpop.f32.mrf.mxu0 }
 0x165   : > { %v1551_v35 = vpop.f32.mrf.mxu1 }
 0x166   : > { %v3784_v18 = vadd.f32 %v1551_v35, %v3726_v32  ;;  %v3786_v47 = vpop.f32.mrf.mxu0 }
 0x167   : > { %v1555_v44 = vpop.f32.mrf.mxu1 }
 0x168   : > { %v3789_v4 = vadd.f32 %v1555_v44, %v3724_v0  ;;  %v3791_v61 = vpop.f32.mrf.mxu0 }
 0x169   : > { %v1557_v30 = vpop.f32.mrf.mxu1 }
 0x16a   : > { %4107 = vst [vmem:[#allocation2_spill] sm:$0xff] %v3789_v4  ;;  %v3794_v14 = vadd.f32 %v1557_v30, %v3726_v32  ;;  %v3796_v49 = vpop.f32.mrf.mxu0 }
 0x16b   : > { %v1559_v51 = vpop.f32.mrf.mxu1 }
 0x16c   : > { %4108 = vst [vmem:[#allocation3_spill] sm:$0xff] %v3794_v14  ;;  %v3799_v52 = vadd.f32 %v1559_v51, %v3724_v0  ;;  %v3801_v16 = vpop.f32.mrf.mxu0 }
 0x16d   : > { %v1561_v34 = vpop.f32.mrf.mxu1 }
 0x16e   : > { %4109 = vst [vmem:[#allocation4_spill] sm:$0xff] %v3799_v52  ;;  %v3804_v43 = vadd.f32 %v1561_v34, %v3726_v32  ;;  %v3806_v31 = vpop.f32.mrf.mxu0 }
 0x16f   : > { %v1565_v15 = vpop.f32.mrf.mxu1 }
 0x170   : > { %4110 = vst [vmem:[#allocation5_spill] sm:$0xff] %v3804_v43  ;;  %v3809_v9 = vadd.f32 %v1565_v15, %v3724_v0  ;;  %v3811_v36 = vpop.f32.mrf.mxu0 }
 0x171   : > { %v1567_v54 = vpop.f32.mrf.mxu1 }
 0x172   : > { %4111 = vst [vmem:[#allocation6_spill] sm:$0xff] %v3809_v9  ;;  %v3814_v37 = vadd.f32 %v1567_v54, %v3726_v32  ;;  %v3816_v53 = vpop.f32.mrf.mxu0 }
 0x173   : > { %v1569_v12 = vpop.f32.mrf.mxu1 }
 0x174   : > { %4112 = vst [vmem:[#allocation7_spill] sm:$0xff] %v3814_v37  ;;  %v3819_v10 = vadd.f32 %v1569_v12, %v3724_v0  ;;  %v3821_v41 = vpop.f32.mrf.mxu0 }
 0x175   : > { %v1571_v13 = vpop.f32.mrf.mxu1 }
 0x176   : > { %4113 = vst [vmem:[#allocation8_spill] sm:$0xff] %v3819_v10  ;;  %v3824_v25 = vadd.f32 %v1571_v13, %v3726_v32  ;;  %v3826_v20 = vpop.f32.mrf.mxu0 }
 0x177   : > { %v1575_v38 = vpop.f32.mrf.mxu1 }
 0x178   : > { %4114 = vst [vmem:[#allocation9_spill] sm:$0xff] %v3824_v25  ;;  %v3829_v50 = vadd.f32 %v1575_v38, %v3724_v0  ;;  %v3831_v8 = vpop.f32.mrf.mxu0 }
 0x179   : > { %v1577_v63 = vpop.f32.mrf.mxu1 }
 0x17a   : > { %4115 = vst [vmem:[#allocation10_spill] sm:$0xff] %v3829_v50  ;;  %v3834_v59 = vadd.f32 %v1577_v63, %v3726_v32  ;;  %v3836_v42 = vpop.f32.mrf.mxu0  ;;  %v1446_v50 = vadd.f32 %v3728_v23, %v3724_v0  ;;  %v1450_v23 = vadd.f32 %v3738_v3, %v3724_v0  ;;  %v1456_v3 = vadd.f32 %v3751_v28, %v3724_v0 }
 0x17b   : > { %v1579_v17 = vpop.f32.mrf.mxu1 }
 0x17c   : > { %4116 = vst [vmem:[#allocation11_spill] sm:$0xff] %v3834_v59  ;;  %v3839_v19 = vadd.f32 %v1579_v17, %v3724_v0  ;;  %v3841_v7 = vpop.f32.mrf.mxu0 }
 0x17d   : > { %v1581_v60 = vpop.f32.mrf.mxu1 }
 0x17e   : > { %4117 = vst [vmem:[#allocation12_spill] sm:$0xff] %v3839_v19  ;;  %v3844_v39 = vadd.f32 %v1581_v60, %v3726_v32  ;;  %v3846_v35 = vpop.f32.mrf.mxu0  ;;  %v2060_v19 = vsub.s32 3, %v3706_v57 }
 0x17f   : > { %v1585_v44 = vpop.f32.mrf.mxu1 }
 0x180   : > { %4118 = vst [vmem:[#allocation13_spill] sm:$0xff] %v3844_v39  ;;  %v3849_v30 = vadd.f32 %v1585_v44, %v3724_v0  ;;  %v3851_v51 = vpop.f32.mrf.mxu0 }
 0x181   : > { %v1587_v34 = vpop.f32.mrf.mxu1 }
 0x182   : > { %4119 = vst [vmem:[#allocation14_spill] sm:$0xff] %v3849_v30  ;;  %v3854_v15 = vadd.f32 %v1587_v34, %v3726_v32  ;;  %v3856_v54 = vpop.f32.mrf.mxu0 }
 0x183   : > { %v1589_v12 = vpop.f32.mrf.mxu1 }
 0x184   : > { %4120 = vst [vmem:[#allocation15_spill] sm:$0xff] %v3854_v15  ;;  %v3859_v13 = vadd.f32 %v1589_v12, %v3724_v0  ;;  %v3861_v38 = vpop.f32.mrf.mxu0  ;;  %v2056_v15 = vsub.s32 1, %v3706_v57 }
 0x185   : > { %v1591_v63 = vpop.f32.mrf.mxu1 }
 0x186   : > { %4121 = vst [vmem:[#allocation16_spill] sm:$0xff] %v3859_v13  ;;  %v3864_v17 = vadd.f32 %v1591_v63, %v3726_v32  ;;  %v3866_v60 = vpop.f32.mrf.mxu0 }
 0x187   : > { %v1595_v44 = vpop.f32.mrf.mxu1 }
 0x188   : > { %4122 = vst [vmem:[#allocation17_spill] sm:$0xff] %v3864_v17  ;;  %v3869_v30 = vadd.f32 %v1595_v44, %v3724_v0  ;;  %v3871_v34 = vpop.f32.mrf.mxu0  ;;  %v2057_v44 = vrot.slane %v3718_v56, %v2056_v15 }
 0x189   : > { %v1597_v39 = vpop.f32.mrf.mxu1 }
 0x18a   : > { %4123 = vst [vmem:[#allocation18_spill] sm:$0xff] %v3869_v30  ;;  %v3875_v12 = vadd.f32 %v1597_v39, %v3726_v32  ;;  %v3877_v13 = vpop.f32.mrf.mxu0  ;;  %v3896_v37 = vrot.slane %v2057_v44, %v2056_v15 }
 0x18b   : > { %v1599_v63 = vpop.f32.mrf.mxu1 }
 0x18c   : > { %4124 = vst [vmem:[#allocation19_spill] sm:$0xff] %v3875_v12  ;;  %v3881_v17 = vadd.f32 %v1599_v63, %v3724_v0  ;;  %v3883_v59 = vpop.f32.mrf.mxu0  ;;  %v2061_v12 = vrot.slane %v3718_v56, %v2060_v19  ;;  %v1448_v63 = vadd.f32 %v3733_v6, %v3726_v32 }
 0x18d   : > { %v1601_v30 = vpop.f32.mrf.mxu1 }
 0x18e   : > { %4125 = vst [vmem:[#allocation20_spill] sm:$0xff] %v3881_v17  ;;  %v3889_v25 = vadd.f32 %v1601_v30, %v3726_v32  ;;  %v3891_v39 = vpop.f32.mrf.mxu0  ;;  %v3900_v52 = vrot.slane %v2061_v12, %v2056_v15 }
 0x18f   : > { %v1638_v57 = vpop.f32.mrf.mxu1 }
 0x190   : > { %4126 = vst [vmem:[#allocation21_spill] sm:$0xff] %v3889_v25  ;;  %v1639_v17 = vadd.f32 %v1638_v57, %v1446_v50  ;;  %v1831_v10 = vpop.f32.mrf.mxu0  ;;  %v1452_v50 = vadd.f32 %v3743_v33, %v3726_v32 }
 0x191   : > { %v1640_v9 = vpop.f32.mrf.mxu1 }
 0x192   : > { %v1832_v43 = vadd.f32 %v1831_v10, %v1639_v17  ;;  %v1641_v30 = vadd.f32 %v1640_v9, %v1448_v63  ;;  %v1833_v25 = vpop.f32.mrf.mxu0 }
 0x193   : > { %v1642_v14 = vpop.f32.mrf.mxu1 }
 0x194   : > { %v2072_v56 = vmul.f32 %v3896_v37, %v1832_v43  ;;  %v1834_v19 = vadd.f32 %v1833_v25, %v1641_v30  ;;  %v1643_v4 = vadd.f32 %v1642_v14, %v1450_v23  ;;  %v1835_v6 = vpop.f32.mrf.mxu0  ;;  %vm1990_vm3 = vcmp.gt.f32.partialorder %v1832_v43, 0.0 }
 0x195   : > { %v1644_v44 = vpop.f32.mrf.mxu1  ;;  %v1458_v14 = vadd.f32 %v3756_v62, %v3726_v32 }
 0x196   : > { %vm1991_vm4 = vcmp.gt.f32.partialorder %v1834_v19, 0.0  ;;  %v2073_v9 = vmul.f32 %v3900_v52, %v1834_v19  ;;  %v1836_v10 = vadd.f32 %v1835_v6, %v1643_v4  ;;  %v1837_v15 = vpop.f32.mrf.mxu0  ;;  %v1645_v17 = vadd.f32 %v1644_v44, %v1452_v50 }
 0x197   : > { %v1648_v12 = vpop.f32.mrf.mxu1  ;;  %v2136_v25 = vsel %vm1990_vm3, %v1832_v43, %v2072_v56  ;;  %v1460_v6 = vadd.f32 %v3761_v45, %v3724_v0 }
 0x198   : > { %v2137_v33 = vsel %vm1991_vm4, %v1834_v19, %v2073_v9  ;;  %v1649_v57 = vadd.f32 %v1648_v12, %v1456_v3  ;;  %v1841_v28 = vpop.f32.mrf.mxu0  ;;  %v2074_v23 = vmul.f32 %v3896_v37, %v1836_v10  ;;  %v1838_v4 = vadd.f32 %v1837_v15, %v1645_v17 }
 0x199   : > { %v2646_v63 = vpack.c.bf16 %v2137_v33, %v2136_v25  ;;  %v1650_v30 = vpop.f32.mrf.mxu1  ;;  %vm1992_vm5 = vcmp.gt.f32.partialorder %v1836_v10, 0.0  ;;  %v1462_v15 = vadd.f32 %v3766_v46, %v3726_v32 }
 0x19a   : > { %v1842_v62 = vadd.f32 %v1841_v28, %v1649_v57  ;;  %v1651_v43 = vadd.f32 %v1650_v30, %v1458_v14  ;;  %v1843_v56 = vpop.f32.mrf.mxu0  ;;  %vm1993_vm6 = vcmp.gt.f32.partialorder %v1838_v4, 0.0  ;;  %v2075_v50 = vmul.f32 %v3900_v52, %v1838_v4 }
 0x19b   : > { %2392 = vst [vmem:[%s3914_s20] sm:$0xff] %v2646_v63  ;;  %v1652_v44 = vpop.f32.mrf.mxu1  ;;  %v2138_v17 = vsel %vm1992_vm5, %v1836_v10, %v2074_v23  ;;  %v1466_v14 = vadd.f32 %v3771_v24, %v3724_v0 }
 0x19c   : > { %v2076_v19 = vmul.f32 %v3896_v37, %v1842_v62  ;;  %v1844_v3 = vadd.f32 %v1843_v56, %v1651_v43  ;;  %v1653_v9 = vadd.f32 %v1652_v44, %v1460_v6  ;;  %v1845_v12 = vpop.f32.mrf.mxu0  ;;  %v2139_v45 = vsel %vm1993_vm6, %v1838_v4, %v2075_v50 }
 0x19d   : > { %vm1994_vm7 = vcmp.gt.f32.partialorder %v1842_v62, 0.0  ;;  %v1654_v25 = vpop.f32.mrf.mxu1  ;;  %v2647_v33 = vpack.c.bf16 %v2139_v45, %v2138_v17  ;;  %v1468_v43 = vadd.f32 %v3776_v40, %v3726_v32  ;;  %v1470_v17 = vadd.f32 %v3781_v27, %v3724_v0 }
 0x19e   : > { %vm1995_vm8 = vcmp.gt.f32.partialorder %v1844_v3, 0.0  ;;  %v2077_v57 = vmul.f32 %v3900_v52, %v1844_v3  ;;  %v1847_v28 = vpop.f32.mrf.mxu0  ;;  %v1846_v63 = vadd.f32 %v1845_v12, %v1653_v9  ;;  %v1655_v30 = vadd.f32 %v1654_v25, %v1462_v15 }
 0x19f   : > { %v1658_v6 = vpop.f32.mrf.mxu1  ;;  %2393 = vst [vmem:[%s3914_s20 + $0x8] sm:$0xff] %v2647_v33  ;;  %v2140_v46 = vsel %vm1994_vm7, %v1842_v62, %v2076_v19 }
 0x1a0   : > { %v2141_v10 = vsel %vm1995_vm8, %v1844_v3, %v2077_v57  ;;  %v1659_v23 = vadd.f32 %v1658_v6, %v1466_v14  ;;  %v1851_v4 = vpop.f32.mrf.mxu0  ;;  %v2078_v24 = vmul.f32 %v3896_v37, %v1846_v63  ;;  %v1848_v50 = vadd.f32 %v1847_v28, %v1655_v30 }
 0x1a1   : > { %v2648_v56 = vpack.c.bf16 %v2141_v10, %v2140_v46  ;;  %v1660_v44 = vpop.f32.mrf.mxu1  ;;  %vm1996_vm9 = vcmp.gt.f32.partialorder %v1846_v63, 0.0  ;;  %v1472_v14 = vadd.f32 %v3786_v47, %v3726_v32  ;;  %v1476_v28 = vadd.f32 %v3791_v61, %v3724_v0 }
 0x1a2   : > { %v1852_v9 = vadd.f32 %v1851_v4, %v1659_v23  ;;  %v1661_v12 = vadd.f32 %v1660_v44, %v1468_v43  ;;  %v1853_v15 = vpop.f32.mrf.mxu0  ;;  %vm1997_vm10 = vcmp.gt.f32.partialorder %v1848_v50, 0.0  ;;  %v2079_v40 = vmul.f32 %v3900_v52, %v1848_v50 }
 0x1a3   : > { %2394 = vst [vmem:[%s3914_s20 + $0x10] sm:$0xff] %v2648_v56  ;;  %v1662_v62 = vpop.f32.mrf.mxu1  ;;  %v2142_v33 = vsel %vm1996_vm9, %v1846_v63, %v2078_v24  ;;  %v1478_v4 = vadd.f32 %v3796_v49, %v3726_v32 }
 0x1a4   : > { %v2080_v19 = vmul.f32 %v3896_v37, %v1852_v9  ;;  %v1854_v3 = vadd.f32 %v1853_v15, %v1661_v12  ;;  %v1663_v45 = vadd.f32 %v1662_v62, %v1470_v17  ;;  %v1855_v25 = vpop.f32.mrf.mxu0  ;;  %v2143_v27 = vsel %vm1997_vm10, %v1848_v50, %v2079_v40 }
 0x1a5   : > { %vm1998_vm11 = vcmp.gt.f32.partialorder %v1852_v9, 0.0  ;;  %v1664_v57 = vpop.f32.mrf.mxu1  ;;  %v2649_v30 = vpack.c.bf16 %v2143_v27, %v2142_v33  ;;  %v1480_v12 = vadd.f32 %v3801_v16, %v3724_v0 }
 0x1a6   : > { %vm1999_vm12 = vcmp.gt.f32.partialorder %v1854_v3, 0.0  ;;  %v2081_v6 = vmul.f32 %v3900_v52, %v1854_v3  ;;  %v1857_v43 = vpop.f32.mrf.mxu0  ;;  %v1856_v46 = vadd.f32 %v1855_v25, %v1663_v45  ;;  %v1665_v10 = vadd.f32 %v1664_v57, %v1472_v14 }
 0x1a7   : > { %v1668_v23 = vpop.f32.mrf.mxu1  ;;  %2395 = vst [vmem:[%s3914_s20 + $0x18] sm:$0xff] %v2649_v30  ;;  %v2144_v47 = vsel %vm1998_vm11, %v1852_v9, %v2080_v19  ;;  %v1482_v14 = vadd.f32 %v3806_v31, %v3726_v32  ;;  %v1486_v57 = vadd.f32 %v3811_v36, %v3724_v0 }
 0x1a8   : > { %v2145_v63 = vsel %vm1999_vm12, %v1854_v3, %v2081_v6  ;;  %v1669_v56 = vadd.f32 %v1668_v23, %v1476_v28  ;;  %v1861_v24 = vpop.f32.mrf.mxu0  ;;  %v2082_v61 = vmul.f32 %v3896_v37, %v1856_v46  ;;  %v1858_v44 = vadd.f32 %v1857_v43, %v1665_v10 }
 0x1a9   : > { %v2650_v50 = vpack.c.bf16 %v2145_v63, %v2144_v47  ;;  %v1670_v17 = vpop.f32.mrf.mxu1  ;;  %vm2000_vm13 = vcmp.gt.f32.partialorder %v1856_v46, 0.0 }
 0x1aa   : > { %v1862_v15 = vadd.f32 %v1861_v24, %v1669_v56  ;;  %v1671_v40 = vadd.f32 %v1670_v17, %v1478_v4  ;;  %v1863_v62 = vpop.f32.mrf.mxu0  ;;  %vm2001_vm14 = vcmp.gt.f32.partialorder %v1858_v44, 0.0  ;;  %v2083_v49 = vmul.f32 %v3900_v52, %v1858_v44 }
 0x1ab   : > { %2396 = vst [vmem:[%s3914_s20 + $0x20] sm:$0xff] %v2650_v50  ;;  %v1672_v9 = vpop.f32.mrf.mxu1  ;;  %v2146_v33 = vsel %vm2000_vm13, %v1856_v46, %v2082_v61  ;;  %v1488_v4 = vadd.f32 %v3816_v53, %v3726_v32  ;;  %v1490_v61 = vadd.f32 %v3821_v41, %v3724_v0 }
 0x1ac   : > { %v2084_v19 = vmul.f32 %v3896_v37, %v1862_v15  ;;  %v1864_v3 = vadd.f32 %v1863_v62, %v1671_v40  ;;  %v1673_v45 = vadd.f32 %v1672_v9, %v1480_v12  ;;  %v1865_v25 = vpop.f32.mrf.mxu0  ;;  %v2147_v16 = vsel %vm2001_vm14, %v1858_v44, %v2083_v49 }
 0x1ad   : > { %vm2002_vm15 = vcmp.gt.f32.partialorder %v1862_v15, 0.0  ;;  %v1674_v27 = vpop.f32.mrf.mxu1  ;;  %v2651_v28 = vpack.c.bf16 %v2147_v16, %v2146_v33 }
 0x1ae   : > { %vm2003_vm0 = vcmp.gt.f32.partialorder %v1864_v3, 0.0  ;;  %v2085_v30 = vmul.f32 %v3900_v52, %v1864_v3  ;;  %v1867_v6 = vpop.f32.mrf.mxu0  ;;  %v1866_v43 = vadd.f32 %v1865_v25, %v1673_v45  ;;  %v1675_v10 = vadd.f32 %v1674_v27, %v1482_v14 }
 0x1af   : > { %v1678_v23 = vpop.f32.mrf.mxu1  ;;  %2397 = vst [vmem:[%s3914_s20 + $0x28] sm:$0xff] %v2651_v28  ;;  %v2148_v31 = vsel %vm2002_vm15, %v1862_v15, %v2084_v19  ;;  %v1492_v19 = vadd.f32 %v3826_v20, %v3726_v32  ;;  %v1496_v25 = vadd.f32 %v3831_v8, %v3724_v0 }
 0x1b0   : > { %v2149_v46 = vsel %vm2003_vm0, %v1864_v3, %v2085_v30  ;;  %v1679_v47 = vadd.f32 %v1678_v23, %v1486_v57  ;;  %v1871_v63 = vpop.f32.mrf.mxu0  ;;  %v2086_v36 = vmul.f32 %v3896_v37, %v1866_v43  ;;  %v1868_v24 = vadd.f32 %v1867_v6, %v1675_v10 }
 0x1b1   : > { %v2652_v56 = vpack.c.bf16 %v2149_v46, %v2148_v31  ;;  %v1680_v50 = vpop.f32.mrf.mxu1  ;;  %vm2004_vm1 = vcmp.gt.f32.partialorder %v1866_v43, 0.0  ;;  %v1498_v30 = vadd.f32 %v3836_v42, %v3726_v32  ;;  %v1500_v46 = vadd.f32 %v3841_v7, %v3724_v0 }
 0x1b2   : > { %v1872_v44 = vadd.f32 %v1871_v63, %v1679_v47  ;;  %v1681_v17 = vadd.f32 %v1680_v50, %v1488_v4  ;;  %v1873_v12 = vpop.f32.mrf.mxu0  ;;  %vm2005_vm2 = vcmp.gt.f32.partialorder %v1868_v24, 0.0  ;;  %v2087_v53 = vmul.f32 %v3900_v52, %v1868_v24 }
 0x1b3   : > { %2398 = vst [vmem:[%s3914_s20 + $0x30] sm:$0xff] %v2652_v56  ;;  %v1682_v15 = vpop.f32.mrf.mxu1  ;;  %v2150_v3 = vsel %vm2004_vm1, %v1866_v43, %v2086_v36 }
 0x1b4   : > { %v2088_v40 = vmul.f32 %v3896_v37, %v1872_v44  ;;  %v1874_v62 = vadd.f32 %v1873_v12, %v1681_v17  ;;  %v1683_v49 = vadd.f32 %v1682_v15, %v1490_v61  ;;  %v1875_v9 = vpop.f32.mrf.mxu0  ;;  %v2151_v41 = vsel %vm2005_vm2, %v1868_v24, %v2087_v53 }
 0x1b5   : > { %vm2006_vm3 = vcmp.gt.f32.partialorder %v1872_v44, 0.0  ;;  %v1684_v45 = vpop.f32.mrf.mxu1  ;;  %v2653_v14 = vpack.c.bf16 %v2151_v41, %v2150_v3  ;;  %v1502_v17 = vadd.f32 %v3846_v35, %v3726_v32  ;;  %v1506_v15 = vadd.f32 %v3851_v51, %v3724_v0 }
 0x1b6   : > { %vm2007_vm4 = vcmp.gt.f32.partialorder %v1874_v62, 0.0  ;;  %v2089_v33 = vmul.f32 %v3900_v52, %v1874_v62  ;;  %v1877_v16 = vpop.f32.mrf.mxu0  ;;  %v1876_v27 = vadd.f32 %v1875_v9, %v1683_v49  ;;  %v1685_v57 = vadd.f32 %v1684_v45, %v1492_v19 }
 0x1b7   : > { %v1688_v28 = vpop.f32.mrf.mxu1  ;;  %2399 = vst [vmem:[%s3914_s20 + $0x38] sm:$0xff] %v2653_v14  ;;  %v2152_v20 = vsel %vm2006_vm3, %v1872_v44, %v2088_v40  ;;  %v1508_v41 = vadd.f32 %v3856_v54, %v3726_v32 }
 0x1b8   : > { %v2153_v6 = vsel %vm2007_vm4, %v1874_v62, %v2089_v33  ;;  %v1689_v43 = vadd.f32 %v1688_v28, %v1496_v25  ;;  %v1881_v10 = vpop.f32.mrf.mxu0  ;;  %v2090_v8 = vmul.f32 %v3896_v37, %v1876_v27  ;;  %v1878_v4 = vadd.f32 %v1877_v16, %v1685_v57 }
 0x1b9   : > { %v2654_v23 = vpack.c.bf16 %v2153_v6, %v2152_v20  ;;  %v1690_v31 = vpop.f32.mrf.mxu1  ;;  %vm2008_vm5 = vcmp.gt.f32.partialorder %v1876_v27, 0.0  ;;  %v1510_v57 = vadd.f32 %v3861_v38, %v3724_v0 }
 0x1ba   : > { %v1882_v47 = vadd.f32 %v1881_v10, %v1689_v43  ;;  %v1691_v63 = vadd.f32 %v1690_v31, %v1498_v30  ;;  %v1883_v56 = vpop.f32.mrf.mxu0  ;;  %vm2009_vm6 = vcmp.gt.f32.partialorder %v1878_v4, 0.0  ;;  %v2091_v42 = vmul.f32 %v3900_v52, %v1878_v4 }
 0x1bb   : > { %2400 = vst [vmem:[%s3914_s20 + $0x40] sm:$0xff] %v2654_v23  ;;  %v1692_v36 = vpop.f32.mrf.mxu1  ;;  %v2154_v12 = vsel %vm2008_vm5, %v1876_v27, %v2090_v8 }
 0x1bc   : > { %v2092_v24 = vmul.f32 %v3896_v37, %v1882_v47  ;;  %v1884_v50 = vadd.f32 %v1883_v56, %v1691_v63  ;;  %v1693_v61 = vadd.f32 %v1692_v36, %v1500_v46  ;;  %v1885_v44 = vpop.f32.mrf.mxu0  ;;  %v2155_v7 = vsel %vm2009_vm6, %v1878_v4, %v2091_v42 }
 0x1bd   : > { %vm2010_vm7 = vcmp.gt.f32.partialorder %v1882_v47, 0.0  ;;  %v1694_v53 = vpop.f32.mrf.mxu1  ;;  %v2655_v40 = vpack.c.bf16 %v2155_v7, %v2154_v12  ;;  %v1512_v4 = vadd.f32 %v3866_v60, %v3726_v32 }
 0x1be   : > { %vm2011_vm8 = vcmp.gt.f32.partialorder %v1884_v50, 0.0  ;;  %v2093_v62 = vmul.f32 %v3900_v52, %v1884_v50  ;;  %v1887_v49 = vpop.f32.mrf.mxu0  ;;  %v1886_v9 = vadd.f32 %v1885_v44, %v1693_v61  ;;  %v1695_v19 = vadd.f32 %v1694_v53, %v1502_v17 }
 0x1bf   : > { %v1698_v3 = vpop.f32.mrf.mxu1  ;;  %2401 = vst [vmem:[%s3914_s20 + $0x48] sm:$0xff] %v2655_v40  ;;  %v2156_v35 = vsel %vm2010_vm7, %v1882_v47, %v2092_v24  ;;  %v1516_v47 = vadd.f32 %v3871_v34, %v3724_v0  ;;  %v1518_v61 = vadd.f32 %v3877_v13, %v3726_v32  ;;  %v1520_v40 = vadd.f32 %v3883_v59, %v3724_v0 }
 0x1c0   : > { %v2157_v45 = vsel %vm2011_vm8, %v1884_v50, %v2093_v62  ;;  %v1699_v25 = vadd.f32 %v1698_v3, %v1506_v15  ;;  %v1891_v14 = vpop.f32.mrf.mxu0  ;;  %v2094_v51 = vmul.f32 %v3896_v37, %v1886_v9  ;;  %v1888_v16 = vadd.f32 %v1887_v49, %v1695_v19 }
 0x1c1   : > { %v2656_v33 = vpack.c.bf16 %v2157_v45, %v2156_v35  ;;  %v1700_v27 = vpop.f32.mrf.mxu1  ;;  %vm2012_vm9 = vcmp.gt.f32.partialorder %v1886_v9, 0.0 }
 0x1c2   : > { %v1892_v28 = vadd.f32 %v1891_v14, %v1699_v25  ;;  %v1701_v30 = vadd.f32 %v1700_v27, %v1508_v41  ;;  %v1893_v20 = vpop.f32.mrf.mxu0  ;;  %vm2013_vm10 = vcmp.gt.f32.partialorder %v1888_v16, 0.0  ;;  %v2095_v54 = vmul.f32 %v3900_v52, %v1888_v16 }
 0x1c3   : > { %2402 = vst [vmem:[%s3914_s20 + $0x50] sm:$0xff] %v2656_v33  ;;  %v1702_v6 = vpop.f32.mrf.mxu1  ;;  %v2158_v31 = vsel %vm2012_vm9, %v1886_v9, %v2094_v51  ;;  %v1522_v25 = vadd.f32 %v3891_v39, %v3726_v32 }
 0x1c4   : > { %v2096_v43 = vmul.f32 %v3896_v37, %v1892_v28  ;;  %v1894_v10 = vadd.f32 %v1893_v20, %v1701_v30  ;;  %v1703_v23 = vadd.f32 %v1702_v6, %v1510_v57  ;;  %v1895_v8 = vpop.f32.mrf.mxu0  ;;  %v2159_v38 = vsel %vm2013_vm10, %v1888_v16, %v2095_v54 }
 0x1c5   : > { %vm2014_vm11 = vcmp.gt.f32.partialorder %v1892_v28, 0.0  ;;  %v1704_v46 = vpop.f32.mrf.mxu1  ;;  %v2657_v63 = vpack.c.bf16 %v2159_v38, %v2158_v31 }
 0x1c6   : > { %vm2015_vm12 = vcmp.gt.f32.partialorder %v1894_v10, 0.0  ;;  %v2097_v56 = vmul.f32 %v3900_v52, %v1894_v10  ;;  %v1897_v42 = vpop.f32.mrf.mxu0  ;;  %v1896_v36 = vadd.f32 %v1895_v8, %v1703_v23  ;;  %v1705_v24 = vadd.f32 %v1704_v46, %v1512_v4 }
 0x1c7   : > { %v1708_v50 = vpop.f32.mrf.mxu1  ;;  %2403 = vst [vmem:[%s3914_s20 + $0x58] sm:$0xff] %v2657_v63  ;;  %v2160_v60 = vsel %vm2014_vm11, %v1892_v28, %v2096_v43 }
 0x1c8   : > { %v2161_v44 = vsel %vm2015_vm12, %v1894_v10, %v2097_v56  ;;  %v1709_v17 = vadd.f32 %v1708_v50, %v1516_v47  ;;  %v1901_v12 = vpop.f32.mrf.mxu0  ;;  %v2098_v34 = vmul.f32 %v3896_v37, %v1896_v36  ;;  %v1898_v53 = vadd.f32 %v1897_v42, %v1705_v24 }
 0x1c9   : > { %v2658_v7 = vpack.c.bf16 %v2161_v44, %v2160_v60  ;;  %v1710_v15 = vpop.f32.mrf.mxu1  ;;  %vm2016_vm13 = vcmp.gt.f32.partialorder %v1896_v36, 0.0 }
 0x1ca   : > { %v1902_v62 = vadd.f32 %v1901_v12, %v1709_v17  ;;  %v1711_v49 = vadd.f32 %v1710_v15, %v1518_v61  ;;  %v1903_v9 = vpop.f32.mrf.mxu0  ;;  %vm2017_vm14 = vcmp.gt.f32.partialorder %v1898_v53, 0.0  ;;  %v2099_v13 = vmul.f32 %v3900_v52, %v1898_v53 }
 0x1cb   : > { %2404 = vst [vmem:[%s3914_s20 + $0x60] sm:$0xff] %v2658_v7  ;;  %v1712_v19 = vpop.f32.mrf.mxu1  ;;  %v2162_v14 = vsel %vm2016_vm13, %v1896_v36, %v2098_v34 }
 0x1cc   : > { %v2100_v3 = vmul.f32 %v3896_v37, %v1902_v62  ;;  %v1904_v41 = vadd.f32 %v1903_v9, %v1711_v49  ;;  %v1713_v35 = vadd.f32 %v1712_v19, %v1520_v40  ;;  %v1905_v45 = vpop.f32.mrf.mxu0  ;;  %v2163_v0 = vsel %vm2017_vm14, %v1898_v53, %v2099_v13 }
 0x1cd   : > { %vm2018_vm15 = vcmp.gt.f32.partialorder %v1902_v62, 0.0  ;;  %v1714_v59 = vpop.f32.mrf.mxu1  ;;  %v2659_v33 = vpack.c.bf16 %v2163_v0, %v2162_v14 }
 0x1ce   : > { %vm2019_vm0 = vcmp.gt.f32.partialorder %v1904_v41, 0.0  ;;  %v2101_v51 = vmul.f32 %v3900_v52, %v1904_v41  ;;  %v1907_v16 = vpop.f32.mrf.mxu0  ;;  %v1906_v27 = vadd.f32 %v1905_v45, %v1713_v35  ;;  %v1715_v57 = vadd.f32 %v1714_v59, %v1522_v25 }
 0x1cf   : > { %v1718_v28 = vpop.f32.mrf.mxu1  ;;  %2405 = vst [vmem:[%s3914_s20 + $0x68] sm:$0xff] %v2659_v33  ;;  %v2164_v30 = vsel %vm2018_vm15, %v1902_v62, %v2100_v3 }
 0x1d0   : > { %v2165_v20 = vsel %vm2019_vm0, %v1904_v41, %v2101_v51  ;;  %v1719_v54 = vadd.f32 %v1718_v28, %v3731_v1  ;;  %v1911_v6 = vpop.f32.mrf.mxu0  ;;  %v2102_v39 = vmul.f32 %v3896_v37, %v1906_v27  ;;  %v1908_v43 = vadd.f32 %v1907_v16, %v1715_v57 }
 0x1d1   : > { %v2660_v32 = vpack.c.bf16 %v2165_v20, %v2164_v30  ;;  %v1720_v10 = vpop.f32.mrf.mxu1  ;;  %vm2020_vm1 = vcmp.gt.f32.partialorder %v1906_v27, 0.0 }
 0x1d2   : > { %v1912_v23 = vadd.f32 %v1911_v6, %v1719_v54  ;;  %v1721_v8 = vadd.f32 %v1720_v10, %v3736_v21  ;;  %v1913_v4 = vpop.f32.mrf.mxu0  ;;  %vm2021_vm2 = vcmp.gt.f32.partialorder %v1908_v43, 0.0  ;;  %v2103_v31 = vmul.f32 %v3900_v52, %v1908_v43 }
 0x1d3   : > { %2406 = vst [vmem:[%s3914_s20 + $0x70] sm:$0xff] %v2660_v32  ;;  %v1722_v38 = vpop.f32.mrf.mxu1  ;;  %v2166_v56 = vsel %vm2020_vm1, %v1906_v27, %v2102_v39 }
 0x1d4   : > { %v2104_v46 = vmul.f32 %v3896_v37, %v1912_v23  ;;  %v1914_v1 = vadd.f32 %v1913_v4, %v1721_v8  ;;  %v1723_v47 = vadd.f32 %v1722_v38, %v3741_v2  ;;  %v1915_v63 = vpop.f32.mrf.mxu0  ;;  %v2167_v42 = vsel %vm2021_vm2, %v1908_v43, %v2103_v31 }
 0x1d5   : > { %vm2022_vm3 = vcmp.gt.f32.partialorder %v1912_v23, 0.0  ;;  %v1724_v36 = vpop.f32.mrf.mxu1  ;;  %v2661_v24 = vpack.c.bf16 %v2167_v42, %v2166_v56 }
 0x1d6   : > { %vm2023_vm4 = vcmp.gt.f32.partialorder %v1914_v1, 0.0  ;;  %v2105_v21 = vmul.f32 %v3900_v52, %v1914_v1  ;;  %v1917_v50 = vpop.f32.mrf.mxu0  ;;  %v1916_v61 = vadd.f32 %v1915_v63, %v1723_v47  ;;  %v1725_v60 = vadd.f32 %v1724_v36, %v3746_v22 }
 0x1d7   : > { %v1728_v44 = vpop.f32.mrf.mxu1  ;;  %2407 = vst [vmem:[%s3914_s20 + $0x78] sm:$0xff] %v2661_v24  ;;  %v2168_v17 = vsel %vm2022_vm3, %v1912_v23, %v2104_v46  ;;  %v4127_v24 = vld [vmem:[#allocation2_spill] sm:$0xff] }
 0x1d8   : > { %v2169_v12 = vsel %vm2023_vm4, %v1914_v1, %v2105_v21  ;;  %v1729_v2 = vadd.f32 %v1728_v44, %v3749_v48  ;;  %v1921_v7 = vpop.f32.mrf.mxu0  ;;  %v2106_v53 = vmul.f32 %v3896_v37, %v1916_v61  ;;  %v1918_v15 = vadd.f32 %v1917_v50, %v1725_v60 }
 0x1d9   : > { %v2662_v34 = vpack.c.bf16 %v2169_v12, %v2168_v17  ;;  %v1730_v40 = vpop.f32.mrf.mxu1  ;;  %vm2024_vm5 = vcmp.gt.f32.partialorder %v1916_v61, 0.0  ;;  %v4128_v12 = vld [vmem:[#allocation3_spill] sm:$0xff] }
 0x1da   : > { %v1922_v62 = vadd.f32 %v1921_v7, %v1729_v2  ;;  %v1731_v49 = vadd.f32 %v1730_v40, %v3754_v5  ;;  %v1923_v9 = vpop.f32.mrf.mxu0  ;;  %vm2025_vm6 = vcmp.gt.f32.partialorder %v1918_v15, 0.0  ;;  %v2107_v22 = vmul.f32 %v3900_v52, %v1918_v15  ;;  %v4129_v40 = vld [vmem:[#allocation4_spill] sm:$0xff] }
 0x1db   : > { %2408 = vst [vmem:[%s3914_s20 + $0x80] sm:$0xff] %v2662_v34  ;;  %v1732_v13 = vpop.f32.mrf.mxu1  ;;  %v2170_v35 = vsel %vm2024_vm5, %v1916_v61, %v2106_v53 }
 0x1dc   : > { %v2108_v19 = vmul.f32 %v3896_v37, %v1922_v62  ;;  %v1924_v48 = vadd.f32 %v1923_v9, %v1731_v49  ;;  %v1733_v3 = vadd.f32 %v1732_v13, %v3759_v55  ;;  %v1925_v41 = vpop.f32.mrf.mxu0  ;;  %v2171_v45 = vsel %vm2025_vm6, %v1918_v15, %v2107_v22 }
 0x1dd   : > { %vm2026_vm7 = vcmp.gt.f32.partialorder %v1922_v62, 0.0  ;;  %v1734_v25 = vpop.f32.mrf.mxu1  ;;  %v2663_v14 = vpack.c.bf16 %v2171_v45, %v2170_v35  ;;  %v4130_v35 = vld [vmem:[#allocation5_spill] sm:$0xff] }
 0x1de   : > { %vm2027_vm8 = vcmp.gt.f32.partialorder %v1924_v48, 0.0  ;;  %v2109_v5 = vmul.f32 %v3900_v52, %v1924_v48  ;;  %v1927_v0 = vpop.f32.mrf.mxu0  ;;  %v1926_v59 = vadd.f32 %v1925_v41, %v1733_v3  ;;  %v1735_v33 = vadd.f32 %v1734_v25, %v3764_v58 }
 0x1df   : > { %v1738_v51 = vpop.f32.mrf.mxu1  ;;  %2409 = vst [vmem:[%s3914_s20 + $0x88] sm:$0xff] %v2663_v14  ;;  %v2172_v16 = vsel %vm2026_vm7, %v1922_v62, %v2108_v19 }
 0x1e0   : > { %v2173_v27 = vsel %vm2027_vm8, %v1924_v48, %v2109_v5  ;;  %v1739_v55 = vadd.f32 %v1738_v51, %v3769_v11  ;;  %v1931_v57 = vpop.f32.mrf.mxu0  ;;  %v2110_v30 = vmul.f32 %v3896_v37, %v1926_v59  ;;  %v1928_v20 = vadd.f32 %v1927_v0, %v1735_v33  ;;  %v4131_v0 = vld [vmem:[#allocation6_spill] sm:$0xff] }
 0x1e1   : > { %v2664_v28 = vpack.c.bf16 %v2173_v27, %v2172_v16  ;;  %v1740_v54 = vpop.f32.mrf.mxu1  ;;  %vm2028_vm9 = vcmp.gt.f32.partialorder %v1926_v59, 0.0 }
 0x1e2   : > { %v1932_v6 = vadd.f32 %v1931_v57, %v1739_v55  ;;  %v1741_v32 = vadd.f32 %v1740_v54, %v3774_v29  ;;  %v1933_v39 = vpop.f32.mrf.mxu0  ;;  %vm2029_vm10 = vcmp.gt.f32.partialorder %v1928_v20, 0.0  ;;  %v2111_v58 = vmul.f32 %v3900_v52, %v1928_v20 }
 0x1e3   : > { %2410 = vst [vmem:[%s3914_s20 + $0x90] sm:$0xff] %v2664_v28  ;;  %v1742_v43 = vpop.f32.mrf.mxu1  ;;  %v2174_v4 = vsel %vm2028_vm9, %v1926_v59, %v2110_v30  ;;  %v4132_v28 = vld [vmem:[#allocation7_spill] sm:$0xff] }
 0x1e4   : > { %v2112_v10 = vmul.f32 %v3896_v37, %v1932_v6  ;;  %v1934_v11 = vadd.f32 %v1933_v39, %v1741_v32  ;;  %v1743_v23 = vadd.f32 %v1742_v43, %v3779_v26  ;;  %v1935_v8 = vpop.f32.mrf.mxu0  ;;  %v2175_v31 = vsel %vm2029_vm10, %v1928_v20, %v2111_v58  ;;  %v4133_v58 = vld [vmem:[#allocation8_spill] sm:$0xff] }
 0x1e5   : > { %vm2030_vm11 = vcmp.gt.f32.partialorder %v1932_v6, 0.0  ;;  %v1744_v38 = vpop.f32.mrf.mxu1  ;;  %v2665_v46 = vpack.c.bf16 %v2175_v31, %v2174_v4 }
 0x1e6   : > { %vm2031_vm12 = vcmp.gt.f32.partialorder %v1934_v11, 0.0  ;;  %v2113_v29 = vmul.f32 %v3900_v52, %v1934_v11  ;;  %v1937_v1 = vpop.f32.mrf.mxu0  ;;  %v1936_v47 = vadd.f32 %v1935_v8, %v1743_v23  ;;  %v1745_v63 = vadd.f32 %v1744_v38, %v3784_v18 }
 0x1e7   : > { %v1748_v56 = vpop.f32.mrf.mxu1  ;;  %2411 = vst [vmem:[%s3914_s20 + $0x98] sm:$0xff] %v2665_v46  ;;  %v2176_v42 = vsel %vm2030_vm11, %v1932_v6, %v2112_v10 }
 0x1e8   : > { %v2177_v36 = vsel %vm2031_vm12, %v1934_v11, %v2113_v29  ;;  %v1749_v26 = vadd.f32 %v1748_v56, %v4127_v24  ;;  %v1941_v21 = vpop.f32.mrf.mxu0  ;;  %v2114_v61 = vmul.f32 %v3896_v37, %v1936_v47  ;;  %v1938_v60 = vadd.f32 %v1937_v1, %v1745_v63  ;;  %v4134_v29 = vld [vmem:[#allocation9_spill] sm:$0xff] }
 0x1e9   : > { %v2666_v50 = vpack.c.bf16 %v2177_v36, %v2176_v42  ;;  %v1750_v44 = vpop.f32.mrf.mxu1  ;;  %vm2032_vm13 = vcmp.gt.f32.partialorder %v1936_v47, 0.0  ;;  %v4135_v42 = vld [vmem:[#allocation10_spill] sm:$0xff] }
 0x1ea   : > { %v1942_v17 = vadd.f32 %v1941_v21, %v1749_v26  ;;  %v1751_v2 = vadd.f32 %v1750_v44, %v4128_v12  ;;  %v1943_v7 = vpop.f32.mrf.mxu0  ;;  %vm2033_vm14 = vcmp.gt.f32.partialorder %v1938_v60, 0.0  ;;  %v2115_v18 = vmul.f32 %v3900_v52, %v1938_v60  ;;  %v4136_v44 = vld [vmem:[#allocation11_spill] sm:$0xff] }
 0x1eb   : > { %2412 = vst [vmem:[%s3914_s20 + $0xa0] sm:$0xff] %v2666_v50  ;;  %v1752_v34 = vpop.f32.mrf.mxu1  ;;  %v2178_v9 = vsel %vm2032_vm13, %v1936_v47, %v2114_v61 }
 0x1ec   : > { %v2116_v53 = vmul.f32 %v3896_v37, %v1942_v17  ;;  %v1944_v15 = vadd.f32 %v1943_v7, %v1751_v2  ;;  %v1753_v62 = vadd.f32 %v1752_v34, %v4129_v40  ;;  %v1945_v49 = vpop.f32.mrf.mxu0  ;;  %v2179_v22 = vsel %vm2033_vm14, %v1938_v60, %v2115_v18 }
 0x1ed   : > { %vm2034_vm15 = vcmp.gt.f32.partialorder %v1942_v17, 0.0  ;;  %v1754_v13 = vpop.f32.mrf.mxu1  ;;  %v2667_v19 = vpack.c.bf16 %v2179_v22, %v2178_v9 }
 0x1ee   : > { %vm2035_vm0 = vcmp.gt.f32.partialorder %v1944_v15, 0.0  ;;  %v2117_v48 = vmul.f32 %v3900_v52, %v1944_v15  ;;  %v1947_v3 = vpop.f32.mrf.mxu0  ;;  %v1946_v41 = vadd.f32 %v1945_v49, %v1753_v62  ;;  %v1755_v45 = vadd.f32 %v1754_v13, %v4130_v35 }
 0x1ef   : > { %v1758_v25 = vpop.f32.mrf.mxu1  ;;  %2413 = vst [vmem:[%s3914_s20 + $0xa8] sm:$0xff] %v2667_v19  ;;  %v2180_v14 = vsel %vm2034_vm15, %v1942_v17, %v2116_v53  ;;  %v4137_v53 = vld [vmem:[#allocation12_spill] sm:$0xff] }
 0x1f0   : > { %v2181_v5 = vsel %vm2035_vm0, %v1944_v15, %v2117_v48  ;;  %v1759_v59 = vadd.f32 %v1758_v25, %v4131_v0  ;;  %v1951_v33 = vpop.f32.mrf.mxu0  ;;  %v2118_v16 = vmul.f32 %v3896_v37, %v1946_v41  ;;  %v1948_v27 = vadd.f32 %v1947_v3, %v1755_v45  ;;  %v4138_v3 = vld [vmem:[#allocation13_spill] sm:$0xff] }
 0x1f1   : > { %v2668_v51 = vpack.c.bf16 %v2181_v5, %v2180_v14  ;;  %v1760_v55 = vpop.f32.mrf.mxu1  ;;  %vm2036_vm1 = vcmp.gt.f32.partialorder %v1946_v41, 0.0  ;;  %v4139_v14 = vld [vmem:[#allocation14_spill] sm:$0xff] }
 0x1f2   : > { %v1952_v57 = vadd.f32 %v1951_v33, %v1759_v59  ;;  %v1761_v30 = vadd.f32 %v1760_v55, %v4132_v28  ;;  %v1953_v20 = vpop.f32.mrf.mxu0  ;;  %vm2037_vm2 = vcmp.gt.f32.partialorder %v1948_v27, 0.0  ;;  %v2119_v54 = vmul.f32 %v3900_v52, %v1948_v27  ;;  %v4140_v55 = vld [vmem:[#allocation15_spill] sm:$0xff] }
 0x1f3   : > { %2414 = vst [vmem:[%s3914_s20 + $0xb0] sm:$0xff] %v2668_v51  ;;  %v1762_v6 = vpop.f32.mrf.mxu1  ;;  %v2182_v11 = vsel %vm2036_vm1, %v1946_v41, %v2118_v16 }
 0x1f4   : > { %v2120_v32 = vmul.f32 %v3896_v37, %v1952_v57  ;;  %v1954_v39 = vadd.f32 %v1953_v20, %v1761_v30  ;;  %v1763_v43 = vadd.f32 %v1762_v6, %v4133_v58  ;;  %v1955_v10 = vpop.f32.mrf.mxu0  ;;  %v2183_v23 = vsel %vm2037_vm2, %v1948_v27, %v2119_v54 }
 0x1f5   : > { %vm2038_vm3 = vcmp.gt.f32.partialorder %v1952_v57, 0.0  ;;  %v1764_v8 = vpop.f32.mrf.mxu1  ;;  %v2669_v4 = vpack.c.bf16 %v2183_v23, %v2182_v11 }
 0x1f6   : > { %vm2039_vm4 = vcmp.gt.f32.partialorder %v1954_v39, 0.0  ;;  %v2121_v31 = vmul.f32 %v3900_v52, %v1954_v39  ;;  %v1957_v38 = vpop.f32.mrf.mxu0  ;;  %v1956_v46 = vadd.f32 %v1955_v10, %v1763_v43  ;;  %v1765_v1 = vadd.f32 %v1764_v8, %v4134_v29 }
 0x1f7   : > { %v1768_v47 = vpop.f32.mrf.mxu1  ;;  %2415 = vst [vmem:[%s3914_s20 + $0xb8] sm:$0xff] %v2669_v4  ;;  %v2184_v63 = vsel %vm2038_vm3, %v1952_v57, %v2120_v32  ;;  %v4141_v32 = vld [vmem:[#allocation16_spill] sm:$0xff] }
 0x1f8   : > { %v2185_v56 = vsel %vm2039_vm4, %v1954_v39, %v2121_v31  ;;  %v1769_v36 = vadd.f32 %v1768_v47, %v4135_v42  ;;  %v1961_v24 = vpop.f32.mrf.mxu0  ;;  %v2122_v21 = vmul.f32 %v3896_v37, %v1956_v46  ;;  %v1958_v50 = vadd.f32 %v1957_v38, %v1765_v1  ;;  %v4142_v38 = vld [vmem:[#allocation17_spill] sm:$0xff] }
 0x1f9   : > { %v2670_v26 = vpack.c.bf16 %v2185_v56, %v2184_v63  ;;  %v1770_v61 = vpop.f32.mrf.mxu1  ;;  %vm2040_vm5 = vcmp.gt.f32.partialorder %v1956_v46, 0.0  ;;  %v4143_v63 = vld [vmem:[#allocation18_spill] sm:$0xff] }
 0x1fa   : > { %v1962_v60 = vadd.f32 %v1961_v24, %v1769_v36  ;;  %v1771_v17 = vadd.f32 %v1770_v61, %v4136_v44  ;;  %v1963_v12 = vpop.f32.mrf.mxu0  ;;  %vm2041_vm6 = vcmp.gt.f32.partialorder %v1958_v50, 0.0  ;;  %v2123_v2 = vmul.f32 %v3900_v52, %v1958_v50  ;;  %v4144_v61 = vld [vmem:[#allocation19_spill] sm:$0xff] }
 0x1fb   : > { %2416 = vst [vmem:[%s3914_s20 + $0xc0] sm:$0xff] %v2670_v26  ;;  %v1772_v7 = vpop.f32.mrf.mxu1  ;;  %v2186_v62 = vsel %vm2040_vm5, %v1956_v46, %v2122_v21 }
 0x1fc   : > { %v2124_v18 = vmul.f32 %v3896_v37, %v1962_v60  ;;  %v1964_v34 = vadd.f32 %v1963_v12, %v1771_v17  ;;  %v1773_v15 = vadd.f32 %v1772_v7, %v4137_v53  ;;  %v1965_v40 = vpop.f32.mrf.mxu0  ;;  %v2187_v49 = vsel %vm2041_vm6, %v1958_v50, %v2123_v2 }
 0x1fd   : > { %vm2042_vm7 = vcmp.gt.f32.partialorder %v1962_v60, 0.0  ;;  %v1774_v9 = vpop.f32.mrf.mxu1  ;;  %v2671_v22 = vpack.c.bf16 %v2187_v49, %v2186_v62 }
 0x1fe   : > { %vm2043_vm8 = vcmp.gt.f32.partialorder %v1964_v34, 0.0  ;;  %v2125_v13 = vmul.f32 %v3900_v52, %v1964_v34  ;;  %v1967_v19 = vpop.f32.mrf.mxu0  ;;  %v1966_v48 = vadd.f32 %v1965_v40, %v1773_v15  ;;  %v1775_v41 = vadd.f32 %v1774_v9, %v4138_v3 }
 0x1ff   : > { %v1778_v35 = vpop.f32.mrf.mxu1  ;;  %2417 = vst [vmem:[%s3914_s20 + $0xc8] sm:$0xff] %v2671_v22  ;;  %v2188_v45 = vsel %vm2042_vm7, %v1962_v60, %v2124_v18  ;;  %v4145_v18 = vld [vmem:[#allocation20_spill] sm:$0xff] }
 0x200   : > { %v2189_v25 = vsel %vm2043_vm8, %v1964_v34, %v2125_v13  ;;  %v1779_v5 = vadd.f32 %v1778_v35, %v4139_v14  ;;  %v1971_v0 = vpop.f32.mrf.mxu0  ;;  %v2126_v33 = vmul.f32 %v3896_v37, %v1966_v48  ;;  %v1968_v51 = vadd.f32 %v1967_v19, %v1775_v41  ;;  %v4146_v19 = vld [vmem:[#allocation21_spill] sm:$0xff] }
 0x201   : > { %v2672_v59 = vpack.c.bf16 %v2189_v25, %v2188_v45  ;;  %v1780_v16 = vpop.f32.mrf.mxu1  ;;  %vm2044_vm9 = vcmp.gt.f32.partialorder %v1966_v48, 0.0 }
 0x202   : > { %v1972_v27 = vadd.f32 %v1971_v0, %v1779_v5  ;;  %v1781_v57 = vadd.f32 %v1780_v16, %v4140_v55  ;;  %v1973_v28 = vpop.f32.mrf.mxu0  ;;  %vm2045_vm10 = vcmp.gt.f32.partialorder %v1968_v51, 0.0  ;;  %v2127_v30 = vmul.f32 %v3900_v52, %v1968_v51 }
 0x203   : > { %2418 = vst [vmem:[%s3914_s20 + $0xd0] sm:$0xff] %v2672_v59  ;;  %v1782_v20 = vpop.f32.mrf.mxu1  ;;  %v2190_v43 = vsel %vm2044_vm9, %v1966_v48, %v2126_v33 }
 0x204   : > { %v2128_v54 = vmul.f32 %v3896_v37, %v1972_v27  ;;  %v1974_v6 = vadd.f32 %v1973_v28, %v1781_v57  ;;  %v1783_v39 = vadd.f32 %v1782_v20, %v4141_v32  ;;  %v1975_v58 = vpop.f32.mrf.mxu0  ;;  %v2191_v10 = vsel %vm2045_vm10, %v1968_v51, %v2127_v30 }
 0x205   : > { %vm2046_vm11 = vcmp.gt.f32.partialorder %v1972_v27, 0.0  ;;  %v1784_v11 = vpop.f32.mrf.mxu1  ;;  %v2673_v23 = vpack.c.bf16 %v2191_v10, %v2190_v43 }
 0x206   : > { %vm2047_vm12 = vcmp.gt.f32.partialorder %v1974_v6, 0.0  ;;  %v2129_v8 = vmul.f32 %v3900_v52, %v1974_v6  ;;  %v1977_v4 = vpop.f32.mrf.mxu0  ;;  %v1976_v31 = vadd.f32 %v1975_v58, %v1783_v39  ;;  %v1785_v46 = vadd.f32 %v1784_v11, %v4142_v38 }
 0x207   : > { %v1788_v29 = vpop.f32.mrf.mxu1  ;;  %2419 = vst [vmem:[%s3914_s20 + $0xd8] sm:$0xff] %v2673_v23  ;;  %v2192_v1 = vsel %vm2046_vm11, %v1972_v27, %v2128_v54 }
 0x208   : > { %v2193_v47 = vsel %vm2047_vm12, %v1974_v6, %v2129_v8  ;;  %v1789_v56 = vadd.f32 %v1788_v29, %v4143_v63  ;;  %v1981_v42 = vpop.f32.mrf.mxu0  ;;  %v2130_v24 = vmul.f32 %v3896_v37, %v1976_v31  ;;  %v1978_v26 = vadd.f32 %v1977_v4, %v1785_v46 }
 0x209   : > { %v2674_v36 = vpack.c.bf16 %v2193_v47, %v2192_v1  ;;  %v1790_v21 = vpop.f32.mrf.mxu1  ;;  %vm2048_vm13 = vcmp.gt.f32.partialorder %v1976_v31, 0.0 }
 0x20a   : > { %v1982_v50 = vadd.f32 %v1981_v42, %v1789_v56  ;;  %v1791_v60 = vadd.f32 %v1790_v21, %v4144_v61  ;;  %v1983_v44 = vpop.f32.mrf.mxu0  ;;  %vm2049_vm14 = vcmp.gt.f32.partialorder %v1978_v26, 0.0  ;;  %v2131_v17 = vmul.f32 %v3900_v52, %v1978_v26 }
 0x20b   : > { %2420 = vst [vmem:[%s3914_s20 + $0xe0] sm:$0xff] %v2674_v36  ;;  %v1792_v12 = vpop.f32.mrf.mxu1  ;;  %v2194_v15 = vsel %vm2048_vm13, %v1976_v31, %v2130_v24 }
 0x20c   : > { %v2132_v2 = vmul.f32 %v3896_v37, %v1982_v50  ;;  %v1984_v7 = vadd.f32 %v1983_v44, %v1791_v60  ;;  %v1793_v34 = vadd.f32 %v1792_v12, %v4145_v18  ;;  %v1985_v53 = vpop.f32.mrf.mxu0  ;;  %v2195_v40 = vsel %vm2049_vm14, %v1978_v26, %v2131_v17 }
 0x20d   : > { %vm2050_vm15 = vcmp.gt.f32.partialorder %v1982_v50, 0.0  ;;  %v1794_v62 = vpop.f32.mrf.mxu1  ;;  %v2675_v49 = vpack.c.bf16 %v2195_v40, %v2194_v15 }
 0x20e   : > { %vm2051_vm0 = vcmp.gt.f32.partialorder %v1984_v7, 0.0  ;;  %v2133_v9 = vmul.f32 %v3900_v52, %v1984_v7  ;;  %v1987_v22 = vpop.f32.mrf.mxu0  ;;  %v1986_v13 = vadd.f32 %v1985_v53, %v1793_v34  ;;  %v1795_v48 = vadd.f32 %v1794_v62, %v4146_v19 }
 0x20f   : > { %2421 = vst [vmem:[%s3914_s20 + $0xe8] sm:$0xff] %v2675_v49  ;;  %v2196_v3 = vsel %vm2050_vm15, %v1982_v50, %v2132_v2 }
 0x210   : > { %v2197_v41 = vsel %vm2051_vm0, %v1984_v7, %v2133_v9  ;;  %v2134_v45 = vmul.f32 %v3896_v37, %v1986_v13  ;;  %v1988_v25 = vadd.f32 %v1987_v22, %v1795_v48  ;;  %vm2052_vm1 = vcmp.gt.f32.partialorder %v1986_v13, 0.0 }
 0x211   : > { %v2676_v35 = vpack.c.bf16 %v2197_v41, %v2196_v3 }
 0x212   : > { %vm2053_vm2 = vcmp.gt.f32.partialorder %v1988_v25, 0.0  ;;  %v2135_v14 = vmul.f32 %v3900_v52, %v1988_v25  ;;  %v2198_v5 = vsel %vm2052_vm1, %v1986_v13, %v2134_v45 }
 0x213   : > { %2422 = vst [vmem:[%s3914_s20 + $0xf0] sm:$0xff] %v2676_v35 }
 0x214   : > { %v2199_v0 = vsel %vm2053_vm2, %v1988_v25, %v2135_v14 }
 0x215   : > { %v2677_v59 = vpack.c.bf16 %v2199_v0, %v2198_v5 }
 0x217   : > { %2423 = vst [vmem:[%s3914_s20 + $0xf8] sm:$0xff] %v2677_v59 }
 0x218 PF: > { %s13_s12 = sadd.s32 1, %s2871_s12  }
 0x219   : > { %p10_p4 = scmp.ge.s32.totalorder %s13_s12, 4  }
 0x21b   :  { %12 = sbr.rel (!%p10_p4) target bundleno = 1 (0x1), region = 62 }

</bundles_post_ra>
